<compile_context>
chip_gen: v7x
topology: tpu7x:2x2x1
jax: 0.10.0
libtpu: 0.0.40
codegen_flags: <defaults>
</compile_context>

<pallas_src>
import functools

import jax
import jax.numpy as jnp
import numpy as np
from jax.experimental import pallas as pl
from jax.experimental.pallas import tpu as pltpu


# ---------------------------------------------------------------------------
# Pallas kernels
# ---------------------------------------------------------------------------
def _up_conv_kernel(x_ref, u_ref, a_ref, b_ref, o_ref, pad_ref):
    """Upsample3DLayer: vertical nearest-upsample (U matmul) + fused
    [horizontal upsample + pad + 3x3 conv] (A matmul) in 2-D row layout.

    x_ref:   (nb*Hin,  Win*C)         input rows, frame-major
    u_ref:   (nb*Hout, nb*Hin)        block-diag vertical nearest-upsample
    a_ref:   (3*Win*C, Wout*C)        fused conv matrix (host precomputed)
    b_ref:   (1, Wout*C)              bias tiled over W
    o_ref:   (nb*Hout, Wout*C)
    pad_ref: (nb, Hout+2, Win*C)      VMEM scratch with vertical zero halo
    """
    nb, hp2, k1 = pad_ref.shape
    h_out = hp2 - 2
    m, _ = o_ref.shape

    up = jnp.dot(u_ref[...], x_ref[...], preferred_element_type=jnp.float32)

    pad_ref[...] = jnp.zeros_like(pad_ref)
    pad_ref[:, 1:h_out + 1, :] = up.reshape(nb, h_out, k1)

    # Three vertically shifted row windows -> one (M, 3*K1) patch matrix.
    taps = [pad_ref[:, dy:dy + h_out, :].reshape(m, k1) for dy in range(3)]
    patch = jnp.concatenate(taps, axis=-1)

    acc = jnp.dot(patch, a_ref[...], preferred_element_type=jnp.float32)
    o_ref[...] = acc + b_ref[...]


def _conv_gn_leaky_kernel(x_ref, a_ref, b_ref, gamma_ref, beta_ref,
                          fbt_ref, fb_ref, gavg_ref, o_ref, pad_ref):
    """Conv2d(3x3) + GroupNorm + LeakyReLU(0.1) in the same 2-D row layout.

    fbt_ref:  (nb, M)   0/1 matrix summing rows of the same frame
    fb_ref:   (M, nb)   0/1 matrix broadcasting per-frame stats back to rows
    gavg_ref: (WC, WC)  group-average matrix incl. 1/(H*W*Cg) normalizer
    gamma/beta are channel params tiled over W, so GroupNorm stays 2-D.
    """
    nb, hp2, k1 = pad_ref.shape
    h = hp2 - 2
    m, _ = o_ref.shape

    pad_ref[...] = jnp.zeros_like(pad_ref)
    pad_ref[:, 1:h + 1, :] = x_ref[...].reshape(nb, h, k1)

    taps = [pad_ref[:, dy:dy + h, :].reshape(m, k1) for dy in range(3)]
    patch = jnp.concatenate(taps, axis=-1)

    acc = jnp.dot(patch, a_ref[...], preferred_element_type=jnp.float32)
    acc = acc + b_ref[...]

    # GroupNorm stats via small 2-D matmuls (no cross-lane relayouts).
    s1 = jnp.dot(fbt_ref[...], acc, preferred_element_type=jnp.float32)
    s2 = jnp.dot(fbt_ref[...], acc * acc, preferred_element_type=jnp.float32)
    mean = jnp.dot(s1, gavg_ref[...], preferred_element_type=jnp.float32)
    msq = jnp.dot(s2, gavg_ref[...], preferred_element_type=jnp.float32)
    var = jnp.maximum(msq - mean * mean, 0.0)       # clamp E[x^2]-E[x]^2 >= 0
    inv = jax.lax.rsqrt(var + 1e-5)
    mean_r = jnp.dot(fb_ref[...], mean, preferred_element_type=jnp.float32)
    inv_r = jnp.dot(fb_ref[...], inv, preferred_element_type=jnp.float32)

    y = (acc - mean_r) * inv_r * gamma_ref[...] + beta_ref[...]
    o_ref[...] = jnp.where(y >= 0, y, 0.1 * y)      # LeakyReLU(0.1)


# ---------------------------------------------------------------------------
# Host-side packing of kernel-ready operands (done once)
# ---------------------------------------------------------------------------
def _build_row_conv_matrix(w_hwio, w_in, w_out):
    """Fold horizontal nearest-upsample (w_in -> w_out), horizontal zero padding
    and the 3x3 conv into a (3*w_in*Cin, w_out*Cout) block-banded matrix.
    Row block dy corresponds to the vertical tap reading (upsampled) row
    ho + dy - 1."""
    w_np = np.asarray(w_hwio, dtype=np.float32)
    _, _, cin, cout = w_np.shape
    a = np.zeros((3 * w_in * cin, w_out * cout), np.float32)
    for dy in range(3):
        base = dy * w_in * cin
        for wo in range(w_out):
            for dx in range(3):
                u = wo + dx - 1                       # column in upsampled frame
                if u < 0 or u >= w_out:
                    continue                          # horizontal zero padding
                wi = (u * w_in) // w_out              # nearest-neighbour source
                a[base + wi * cin: base + (wi + 1) * cin,
                  wo * cout:(wo + 1) * cout] += w_np[dy, dx]
    return a


def _vert_upsample_matrix(nb, h_in, h_out):
    """Block-diagonal (nb*h_out, nb*h_in) nearest-neighbour row-selection."""
    u = np.zeros((h_out, h_in), np.float32)
    src = (np.arange(h_out) * h_in) // h_out
    u[np.arange(h_out), src] = 1.0
    return np.kron(np.eye(nb, dtype=np.float32), u)


def _frame_bcast_matrix(nb, h):
    """(nb*h, nb) 0/1 matrix: row r belongs to frame r // h."""
    fr = np.arange(nb * h) // h
    return (fr[:, None] == np.arange(nb)[None, :]).astype(np.float32)


def _group_avg_matrix(w, c, groups, h):
    cg = c // groups
    lane_group = (np.arange(w * c) % c) // cg
    same = (lane_group[:, None] == lane_group[None, :]).astype(np.float32)
    return same / float(h * w * cg)


def _tile_channel_vec(v, w):
    return jnp.asarray(np.tile(np.asarray(v, np.float32).reshape(-1), w)[None, :])


def _num_grid_steps(n):
    # >= 2 parallel steps when possible so dual-TensorCore chips (v7x) split
    # the batch; v5e/v6e simply run the blocks back to back.
    return 2 if (n >= 2 and n % 2 == 0) else 1


def pack_params(params, input_hw, n_frames, target_shape_list,
                num_conv_per_up_list):
    """Pre-fuse all weights into the exact layouts the kernels consume."""
    h0, w0 = input_hw
    steps = _num_grid_steps(n_frames)
    nb = n_frames // steps
    packed = {}
    h_cur, w_cur = h0, w0
    for i, tgt in enumerate(target_shape_list):
        _, ht, wt, c_out = tgt
        groups = max(1, c_out // 4)
        packed[f"up{i}_U"] = jnp.asarray(_vert_upsample_matrix(nb, h_cur, ht))
        packed[f"up{i}_A"] = jnp.asarray(
            _build_row_conv_matrix(params[f"up{i}_w"], w_cur, wt))
        packed[f"up{i}_b"] = _tile_channel_vec(params[f"up{i}_b"], wt)
        h_cur, w_cur = ht, wt
        fb = _frame_bcast_matrix(nb, ht)
        packed[f"fb{i}"] = jnp.asarray(fb)
        packed[f"fbT{i}"] = jnp.asarray(np.ascontiguousarray(fb.T))
        packed[f"gavg{i}"] = jnp.asarray(_group_avg_matrix(wt, c_out, groups, ht))
        for j in range(num_conv_per_up_list[i]):
            packed[f"cb{i}_{j}_A"] = jnp.asarray(
                _build_row_conv_matrix(params[f"cb{i}_{j}_w"], wt, wt))
            packed[f"cb{i}_{j}_b"] = _tile_channel_vec(params[f"cb{i}_{j}_b"], wt)
            packed[f"cb{i}_{j}_gamma"] = _tile_channel_vec(
                params[f"cb{i}_{j}_gamma"], wt)
            packed[f"cb{i}_{j}_beta"] = _tile_channel_vec(
                params[f"cb{i}_{j}_beta"], wt)
    return packed


# ---------------------------------------------------------------------------
# pallas_call wrappers
# ---------------------------------------------------------------------------
def up_conv_pallas(x2d, u_mat, a_mat, bias_t, *, steps, nb, h_in, h_out,
                   k1, wc_out):
    m_out = steps * nb * h_out
    cost = pl.CostEstimate(
        flops=int(steps * (2 * nb * h_out * nb * h_in * k1
                           + 2 * nb * h_out * 3 * k1 * wc_out)),
        transcendentals=0,
        bytes_accessed=int(4 * (x2d.size + u_mat.size + a_mat.size
                                + bias_t.size + m_out * wc_out)))
    return pl.pallas_call(
        _up_conv_kernel,
        out_shape=jax.ShapeDtypeStruct((m_out, wc_out), jnp.float32),
        grid=(steps,),
        in_specs=[
            pl.BlockSpec((nb * h_in, k1), lambda g: (g, 0)),
            pl.BlockSpec(u_mat.shape, lambda g: (0, 0)),
            pl.BlockSpec(a_mat.shape, lambda g: (0, 0)),
            pl.BlockSpec((1, wc_out), lambda g: (0, 0)),
        ],
        out_specs=pl.BlockSpec((nb * h_out, wc_out), lambda g: (g, 0)),
        scratch_shapes=[pltpu.VMEM((nb, h_out + 2, k1), jnp.float32)],
        compiler_params=pltpu.CompilerParams(dimension_semantics=("parallel",)),
        cost_estimate=cost,
    )(x2d, u_mat, a_mat, bias_t)


def conv_gn_leaky_pallas(x2d, a_mat, bias_t, gamma_t, beta_t, fbt, fb, gavg,
                         *, steps, nb, h, k1, wc_out):
    m_blk = nb * h
    m_out = steps * m_blk
    cost = pl.CostEstimate(
        flops=int(steps * (2 * m_blk * 3 * k1 * wc_out
                           + 8 * m_blk * nb * wc_out
                           + 4 * nb * wc_out * wc_out)),
        transcendentals=int(steps * nb * wc_out),
        bytes_accessed=int(4 * (x2d.size + a_mat.size + gavg.size
                                + fb.size + fbt.size + m_out * wc_out)))
    return pl.pallas_call(
        _conv_gn_leaky_kernel,
        out_shape=jax.ShapeDtypeStruct((m_out, wc_out), jnp.float32),
        grid=(steps,),
        in_specs=[
            pl.BlockSpec((m_blk, k1), lambda g: (g, 0)),
            pl.BlockSpec(a_mat.shape, lambda g: (0, 0)),
            pl.BlockSpec((1, wc_out), lambda g: (0, 0)),
            pl.BlockSpec((1, wc_out), lambda g: (0, 0)),
            pl.BlockSpec((1, wc_out), lambda g: (0, 0)),
            pl.BlockSpec(fbt.shape, lambda g: (0, 0)),
            pl.BlockSpec(fb.shape, lambda g: (0, 0)),
            pl.BlockSpec(gavg.shape, lambda g: (0, 0)),
        ],
        out_specs=pl.BlockSpec((m_blk, wc_out), lambda g: (g, 0)),
        scratch_shapes=[pltpu.VMEM((nb, h + 2, k1), jnp.float32)],
        compiler_params=pltpu.CompilerParams(dimension_semantics=("parallel",)),
        cost_estimate=cost,
    )(x2d, a_mat, bias_t, gamma_t, beta_t, fbt, fb, gavg)


# ---------------------------------------------------------------------------
# Decoder forward (Pallas) and pure-JAX reference
# ---------------------------------------------------------------------------
def decoder_forward(x, packed, target_shape_list, num_conv_per_up_list):
    """x: (B, T, H, W, C) -> (B, T, H', W', C')."""
    B, T, H, W, C = x.shape
    n = B * T
    steps = _num_grid_steps(n)
    nb = n // steps
    a = x.reshape(n * H, W * C)                      # lane-dense 2-D carrier
    h_cur, w_cur, c_cur = H, W, C
    for i, tgt in enumerate(target_shape_list):
        _, ht, wt, c_out = tgt
        # Upsample3DLayer: vertical upsample + horizontal upsample + pad +
        # Conv2d(C->C, 3x3), all fused into one kernel.
        a = up_conv_pallas(a, packed[f"up{i}_U"], packed[f"up{i}_A"],
                           packed[f"up{i}_b"], steps=steps, nb=nb,
                           h_in=h_cur, h_out=ht,
                           k1=w_cur * c_cur, wc_out=wt * c_cur)
        h_cur, w_cur = ht, wt
        # K x [Conv2d(3x3) + GroupNorm + LeakyReLU(0.1)]
        for j in range(num_conv_per_up_list[i]):
            c_in = c_cur if j == 0 else c_out
            a = conv_gn_leaky_pallas(
                a, packed[f"cb{i}_{j}_A"], packed[f"cb{i}_{j}_b"],
                packed[f"cb{i}_{j}_gamma"], packed[f"cb{i}_{j}_beta"],
                packed[f"fbT{i}"], packed[f"fb{i}"], packed[f"gavg{i}"],
                steps=steps, nb=nb, h=ht, k1=wt * c_in, wc_out=wt * c_out)
        if num_conv_per_up_list[i] > 0:
            c_cur = c_out
    return a.reshape(B, T, h_cur, w_cur, c_cur)


def nearest_upsample_ref(x, h_out, w_out):
    # x: (B, T, Hin, Win, C), matches torch nn.Upsample(mode='nearest')
    h_in, w_in = x.shape[2], x.shape[3]
    hi = (jnp.arange(h_out) * h_in) // h_out
    wi = (jnp.arange(w_out) * w_in) // w_out
    return x[:, :, hi][:, :, :, wi]


def _ref_conv3x3(x, w, b):
    y = jax.lax.conv_general_dilated(
        x, w, window_strides=(1, 1), padding="SAME",
        dimension_numbers=("NHWC", "HWIO", "NHWC"))
    return y + b


def _ref_groupnorm(x, gamma, beta, groups, eps=1e-5):
    N, H, W, C = x.shape
    cg = C // groups
    xg = x.reshape(N, H, W, groups, cg)
    mean = xg.mean(axis=(1, 2, 4), keepdims=True)
    var = ((xg - mean) ** 2).mean(axis=(1, 2, 4), keepdims=True)
    y = ((xg - mean) / jnp.sqrt(var + eps)).reshape(N, H, W, C)
    return y * gamma + beta


def decoder_forward_ref(x, params, target_shape_list, num_conv_per_up_list):
    for i, tgt in enumerate(target_shape_list):
        _, ht, wt, c_out = tgt
        groups = max(1, c_out // 4)
        x = nearest_upsample_ref(x, ht, wt)
        B, T, H, W, C = x.shape
        xf = x.reshape(B * T, H, W, C)
        xf = _ref_conv3x3(xf, params[f"up{i}_w"], params[f"up{i}_b"])
        for j in range(num_conv_per_up_list[i]):
            xf = _ref_conv3x3(xf, params[f"cb{i}_{j}_w"], params[f"cb{i}_{j}_b"])
            xf = _ref_groupnorm(xf, params[f"cb{i}_{j}_gamma"],
                                params[f"cb{i}_{j}_beta"], groups)
            xf = jnp.where(xf >= 0, xf, 0.1 * xf)
        x = xf.reshape(B, T, H, W, -1)
    return x


# ---------------------------------------------------------------------------
# Deterministic synthetic parameters (shapes follow the module's __init__)
# ---------------------------------------------------------------------------
def make_params(key, in_dim, target_shape_list, num_conv_per_up_list):
    params = {}
    dims = [in_dim] + [s[-1] for s in target_shape_list]
    for i, tgt in enumerate(target_shape_list):
        cin = dims[i]
        cout = tgt[-1]
        key, k1, k2 = jax.random.split(key, 3)
        params[f"up{i}_w"] = 0.1 * jax.random.normal(k1, (3, 3, cin, cin), jnp.float32)
        params[f"up{i}_b"] = 0.1 * jax.random.normal(k2, (1, cin), jnp.float32)
        cprev = cin
        for j in range(num_conv_per_up_list[i]):
            key, k1, k2, k3, k4 = jax.random.split(key, 5)
            params[f"cb{i}_{j}_w"] = 0.1 * jax.random.normal(
                k1, (3, 3, cprev, cout), jnp.float32)
            params[f"cb{i}_{j}_b"] = 0.1 * jax.random.normal(k2, (1, cout), jnp.float32)
            params[f"cb{i}_{j}_gamma"] = 1.0 + 0.05 * jax.random.normal(
                k3, (1, cout), jnp.float32)
            params[f"cb{i}_{j}_beta"] = 0.05 * jax.random.normal(
                k4, (1, cout), jnp.float32)
            cprev = cout
    return params


# ---------------------------------------------------------------------------
if __name__ == "__main__":
    key = jax.random.PRNGKey(0)
    kx, kp = jax.random.split(key)

    # Decoder config: x (B, T, 4, 4, 16) -> (B, T, 8, 8, 8) -> (B, T, 16, 16, 4)
    B, T, H0, W0, in_dim = 2, 4, 4, 4, 16
    target_shape_list = [(T, 8, 8, 8), (T, 16, 16, 4)]
    num_conv_per_up_list = [1, 1]

    x = jax.random.normal(kx, (B, T, H0, W0, in_dim), jnp.float32)
    params = make_params(kp, in_dim, target_shape_list, num_conv_per_up_list)
    packed = pack_params(params, (H0, W0), B * T,
                         target_shape_list, num_conv_per_up_list)

    fwd = jax.jit(functools.partial(
        decoder_forward,
        target_shape_list=tuple(target_shape_list),
        num_conv_per_up_list=tuple(num_conv_per_up_list)))

    out = jax.block_until_ready(fwd(x, packed))
    ref = jax.block_until_ready(
        decoder_forward_ref(x, params, target_shape_list, num_conv_per_up_list))

    assert out.shape == (B, T, 16, 16, 4), out.shape
    np.testing.assert_allclose(np.asarray(out), np.asarray(ref),
                               rtol=1e-3, atol=1e-3)
    print("KERNEL_OK")
</pallas_src>

<mosaic_0001>
module attributes {stable_mosaic.version = 11 : i64} {
  func.func @_up_conv_kernel(%arg0: i32, %arg1: memref<16x64xf32, #tpu.memory_space<vmem>>, %arg2: memref<32x16xf32, #tpu.memory_space<vmem>>, %arg3: memref<192x128xf32, #tpu.memory_space<vmem>>, %arg4: memref<1x128xf32, #tpu.memory_space<vmem>>, %arg5: memref<32x128xf32, #tpu.memory_space<vmem>>, %arg6: memref<4x10x64xf32, #tpu.memory_space<vmem>>) attributes {dimension_semantics = [#tpu.dimension_semantics<parallel>], iteration_bounds = array<i64: 2>, scalar_prefetch = 0 : i64, scratch_operands = 1 : i64, tpu.core_type = #tpu.core_type<tc>, window_params = [{transform_indices = @transform_0, window_bounds = array<i64: 16, 64>}, {pipeline_mode = #tpu.pipeline_mode<synchronous>, transform_indices = @transform_1, window_bounds = array<i64: 32, 16>}, {pipeline_mode = #tpu.pipeline_mode<synchronous>, transform_indices = @transform_2, window_bounds = array<i64: 192, 128>}, {pipeline_mode = #tpu.pipeline_mode<synchronous>, transform_indices = @transform_3, window_bounds = array<i64: 1, 128>}, {transform_indices = @transform_4, window_bounds = array<i64: 32, 128>}]} {
    %c0 = arith.constant 0 : index
    %c0_0 = arith.constant 0 : index
    %0 = vector.load %arg2[%c0, %c0_0] : memref<32x16xf32, #tpu.memory_space<vmem>>, vector<32x16xf32>
    %c0_1 = arith.constant 0 : index
    %c0_2 = arith.constant 0 : index
    %1 = vector.load %arg1[%c0_1, %c0_2] : memref<16x64xf32, #tpu.memory_space<vmem>>, vector<16x64xf32>
    %cst = arith.constant dense<0.000000e+00> : vector<32x64xf32>
    %2 = tpu.matmul %0, %1, %cst {dimension_numbers = #tpu.dot_dimension_numbers<[1], [0], [0], [1], [0, 0, 1, 1], [], []>} : vector<32x16xf32>, vector<16x64xf32>, vector<32x64xf32> -> vector<32x64xf32>
    %cst_3 = arith.constant 0.000000e+00 : f32
    %3 = vector.broadcast %cst_3 : f32 to vector<4x10x64xf32>
    %c0_4 = arith.constant 0 : index
    %c0_5 = arith.constant 0 : index
    %c0_6 = arith.constant 0 : index
    %4 = vector.load %arg6[%c0_4, %c0_5, %c0_6] : memref<4x10x64xf32, #tpu.memory_space<vmem>>, vector<4x10x64xf32>
    tpu.vector_store %arg6[%c0_4, %c0_5, %c0_6], %3 {strides = array<i32>} : memref<4x10x64xf32, #tpu.memory_space<vmem>>, vector<4x10x64xf32>,
    %5 = vector.shape_cast %2 : vector<32x64xf32> to vector<4x8x64xf32>
    %c0_7 = arith.constant 0 : index
    %c1 = arith.constant 1 : index
    %c0_8 = arith.constant 0 : index
    %6 = vector.load %arg6[%c0_7, %c1, %c0_8] : memref<4x10x64xf32, #tpu.memory_space<vmem>>, vector<4x8x64xf32>
    tpu.vector_store %arg6[%c0_7, %c1, %c0_8], %5 {strides = array<i32>} : memref<4x10x64xf32, #tpu.memory_space<vmem>>, vector<4x8x64xf32>,
    %c0_9 = arith.constant 0 : index
    %c0_10 = arith.constant 0 : index
    %c0_11 = arith.constant 0 : index
    %7 = vector.load %arg6[%c0_9, %c0_10, %c0_11] : memref<4x10x64xf32, #tpu.memory_space<vmem>>, vector<4x8x64xf32>
    %8 = vector.shape_cast %7 : vector<4x8x64xf32> to vector<32x64xf32>
    %c0_12 = arith.constant 0 : index
    %c1_13 = arith.constant 1 : index
    %c0_14 = arith.constant 0 : index
    %9 = vector.load %arg6[%c0_12, %c1_13, %c0_14] : memref<4x10x64xf32, #tpu.memory_space<vmem>>, vector<4x8x64xf32>
    %10 = vector.shape_cast %9 : vector<4x8x64xf32> to vector<32x64xf32>
    %c0_15 = arith.constant 0 : index
    %c2 = arith.constant 2 : index
    %c0_16 = arith.constant 0 : index
    %11 = vector.load %arg6[%c0_15, %c2, %c0_16] : memref<4x10x64xf32, #tpu.memory_space<vmem>>, vector<4x8x64xf32>
    %12 = vector.shape_cast %11 : vector<4x8x64xf32> to vector<32x64xf32>
    %13 = tpu.concatenate %8, %10, %12 in 1 : vector<32x64xf32>, vector<32x64xf32>, vector<32x64xf32> -> vector<32x192xf32>
    %c0_17 = arith.constant 0 : index
    %c0_18 = arith.constant 0 : index
    %14 = vector.load %arg3[%c0_17, %c0_18] : memref<192x128xf32, #tpu.memory_space<vmem>>, vector<192x128xf32>
    %cst_19 = arith.constant dense<0.000000e+00> : vector<32x128xf32>
    %15 = tpu.matmul %13, %14, %cst_19 {dimension_numbers = #tpu.dot_dimension_numbers<[1], [0], [0], [1], [0, 0, 1, 1], [], []>} : vector<32x192xf32>, vector<192x128xf32>, vector<32x128xf32> -> vector<32x128xf32>
    %c0_20 = arith.constant 0 : index
    %c0_21 = arith.constant 0 : index
    %16 = vector.load %arg4[%c0_20, %c0_21] : memref<1x128xf32, #tpu.memory_space<vmem>>, vector<1x128xf32>
    %17 = vector.broadcast %16 : vector<1x128xf32> to vector<32x128xf32>
    %18 = arith.addf %15, %17 : vector<32x128xf32>
    %c0_22 = arith.constant 0 : index
    %c0_23 = arith.constant 0 : index
    %19 = vector.load %arg5[%c0_22, %c0_23] : memref<32x128xf32, #tpu.memory_space<vmem>>, vector<32x128xf32>
    tpu.vector_store %arg5[%c0_22, %c0_23], %18 {strides = array<i32>} : memref<32x128xf32, #tpu.memory_space<vmem>>, vector<32x128xf32>,
    return
  }
  func.func @transform_0(%arg0: i32) -> (i32, i32) {
    %c0_i32 = arith.constant 0 : i32
    %c0_i32_0 = arith.constant 0 : i32
    return %arg0, %c0_i32 : i32, i32
  }
  func.func @transform_1(%arg0: i32) -> (i32, i32) {
    %c0_i32 = arith.constant 0 : i32
    %c0_i32_0 = arith.constant 0 : i32
    %c0_i32_1 = arith.constant 0 : i32
    return %c0_i32, %c0_i32_0 : i32, i32
  }
  func.func @transform_2(%arg0: i32) -> (i32, i32) {
    %c0_i32 = arith.constant 0 : i32
    %c0_i32_0 = arith.constant 0 : i32
    %c0_i32_1 = arith.constant 0 : i32
    return %c0_i32, %c0_i32_0 : i32, i32
  }
  func.func @transform_3(%arg0: i32) -> (i32, i32) {
    %c0_i32 = arith.constant 0 : i32
    %c0_i32_0 = arith.constant 0 : i32
    %c0_i32_1 = arith.constant 0 : i32
    return %c0_i32, %c0_i32_0 : i32, i32
  }
  func.func @transform_4(%arg0: i32) -> (i32, i32) {
    %c0_i32 = arith.constant 0 : i32
    %c0_i32_0 = arith.constant 0 : i32
    return %arg0, %c0_i32 : i32, i32
  }
}

module attributes {stable_mosaic.version = 11 : i64} {
  func.func @_conv_gn_leaky_kernel(%arg0: i32, %arg1: memref<32x128xf32, #tpu.memory_space<vmem>>, %arg2: memref<384x64xf32, #tpu.memory_space<vmem>>, %arg3: memref<1x64xf32, #tpu.memory_space<vmem>>, %arg4: memref<1x64xf32, #tpu.memory_space<vmem>>, %arg5: memref<1x64xf32, #tpu.memory_space<vmem>>, %arg6: memref<4x32xf32, #tpu.memory_space<vmem>>, %arg7: memref<32x4xf32, #tpu.memory_space<vmem>>, %arg8: memref<64x64xf32, #tpu.memory_space<vmem>>, %arg9: memref<32x64xf32, #tpu.memory_space<vmem>>, %arg10: memref<4x10x128xf32, #tpu.memory_space<vmem>>) attributes {dimension_semantics = [#tpu.dimension_semantics<parallel>], iteration_bounds = array<i64: 2>, scalar_prefetch = 0 : i64, scratch_operands = 1 : i64, tpu.core_type = #tpu.core_type<tc>, window_params = [{transform_indices = @transform_0, window_bounds = array<i64: 32, 128>}, {pipeline_mode = #tpu.pipeline_mode<synchronous>, transform_indices = @transform_1, window_bounds = array<i64: 384, 64>}, {pipeline_mode = #tpu.pipeline_mode<synchronous>, transform_indices = @transform_2, window_bounds = array<i64: 1, 64>}, {pipeline_mode = #tpu.pipeline_mode<synchronous>, transform_indices = @transform_3, window_bounds = array<i64: 1, 64>}, {pipeline_mode = #tpu.pipeline_mode<synchronous>, transform_indices = @transform_4, window_bounds = array<i64: 1, 64>}, {pipeline_mode = #tpu.pipeline_mode<synchronous>, transform_indices = @transform_5, window_bounds = array<i64: 4, 32>}, {pipeline_mode = #tpu.pipeline_mode<synchronous>, transform_indices = @transform_6, window_bounds = array<i64: 32, 4>}, {pipeline_mode = #tpu.pipeline_mode<synchronous>, transform_indices = @transform_7, window_bounds = array<i64: 64, 64>}, {transform_indices = @transform_8, window_bounds = array<i64: 32, 64>}]} {
    %cst = arith.constant 0.000000e+00 : f32
    %0 = vector.broadcast %cst : f32 to vector<4x10x128xf32>
    %c0 = arith.constant 0 : index
    %c0_0 = arith.constant 0 : index
    %c0_1 = arith.constant 0 : index
    %1 = vector.load %arg10[%c0, %c0_0, %c0_1] : memref<4x10x128xf32, #tpu.memory_space<vmem>>, vector<4x10x128xf32>
    tpu.vector_store %arg10[%c0, %c0_0, %c0_1], %0 {strides = array<i32>} : memref<4x10x128xf32, #tpu.memory_space<vmem>>, vector<4x10x128xf32>,
    %c0_2 = arith.constant 0 : index
    %c0_3 = arith.constant 0 : index
    %2 = vector.load %arg1[%c0_2, %c0_3] : memref<32x128xf32, #tpu.memory_space<vmem>>, vector<32x128xf32>
    %3 = vector.shape_cast %2 : vector<32x128xf32> to vector<4x8x128xf32>
    %c0_4 = arith.constant 0 : index
    %c1 = arith.constant 1 : index
    %c0_5 = arith.constant 0 : index
    %4 = vector.load %arg10[%c0_4, %c1, %c0_5] : memref<4x10x128xf32, #tpu.memory_space<vmem>>, vector<4x8x128xf32>
    tpu.vector_store %arg10[%c0_4, %c1, %c0_5], %3 {strides = array<i32>} : memref<4x10x128xf32, #tpu.memory_space<vmem>>, vector<4x8x128xf32>,
    %c0_6 = arith.constant 0 : index
    %c0_7 = arith.constant 0 : index
    %c0_8 = arith.constant 0 : index
    %5 = vector.load %arg10[%c0_6, %c0_7, %c0_8] : memref<4x10x128xf32, #tpu.memory_space<vmem>>, vector<4x8x128xf32>
    %6 = vector.shape_cast %5 : vector<4x8x128xf32> to vector<32x128xf32>
    %c0_9 = arith.constant 0 : index
    %c1_10 = arith.constant 1 : index
    %c0_11 = arith.constant 0 : index
    %7 = vector.load %arg10[%c0_9, %c1_10, %c0_11] : memref<4x10x128xf32, #tpu.memory_space<vmem>>, vector<4x8x128xf32>
    %8 = vector.shape_cast %7 : vector<4x8x128xf32> to vector<32x128xf32>
    %c0_12 = arith.constant 0 : index
    %c2 = arith.constant 2 : index
    %c0_13 = arith.constant 0 : index
    %9 = vector.load %arg10[%c0_12, %c2, %c0_13] : memref<4x10x128xf32, #tpu.memory_space<vmem>>, vector<4x8x128xf32>
    %10 = vector.shape_cast %9 : vector<4x8x128xf32> to vector<32x128xf32>
    %11 = tpu.concatenate %6, %8, %10 in 1 : vector<32x128xf32>, vector<32x128xf32>, vector<32x128xf32> -> vector<32x384xf32>
    %c0_14 = arith.constant 0 : index
    %c0_15 = arith.constant 0 : index
    %12 = vector.load %arg2[%c0_14, %c0_15] : memref<384x64xf32, #tpu.memory_space<vmem>>, vector<384x64xf32>
    %cst_16 = arith.constant dense<0.000000e+00> : vector<32x64xf32>
    %13 = tpu.matmul %11, %12, %cst_16 {dimension_numbers = #tpu.dot_dimension_numbers<[1], [0], [0], [1], [0, 0, 1, 1], [], []>} : vector<32x384xf32>, vector<384x64xf32>, vector<32x64xf32> -> vector<32x64xf32>
    %c0_17 = arith.constant 0 : index
    %c0_18 = arith.constant 0 : index
    %14 = vector.load %arg3[%c0_17, %c0_18] : memref<1x64xf32, #tpu.memory_space<vmem>>, vector<1x64xf32>
    %15 = vector.broadcast %14 : vector<1x64xf32> to vector<32x64xf32>
    %16 = arith.addf %13, %15 : vector<32x64xf32>
    %c0_19 = arith.constant 0 : index
    %c0_20 = arith.constant 0 : index
    %17 = vector.load %arg6[%c0_19, %c0_20] : memref<4x32xf32, #tpu.memory_space<vmem>>, vector<4x32xf32>
    %cst_21 = arith.constant dense<0.000000e+00> : vector<4x64xf32>
    %18 = tpu.matmul %17, %16, %cst_21 {dimension_numbers = #tpu.dot_dimension_numbers<[1], [0], [0], [1], [0, 0, 1, 1], [], []>} : vector<4x32xf32>, vector<32x64xf32>, vector<4x64xf32> -> vector<4x64xf32>
    %c0_22 = arith.constant 0 : index
    %c0_23 = arith.constant 0 : index
    %19 = vector.load %arg6[%c0_22, %c0_23] : memref<4x32xf32, #tpu.memory_space<vmem>>, vector<4x32xf32>
    %20 = arith.mulf %16, %16 : vector<32x64xf32>
    %cst_24 = arith.constant dense<0.000000e+00> : vector<4x64xf32>
    %21 = tpu.matmul %19, %20, %cst_24 {dimension_numbers = #tpu.dot_dimension_numbers<[1], [0], [0], [1], [0, 0, 1, 1], [], []>} : vector<4x32xf32>, vector<32x64xf32>, vector<4x64xf32> -> vector<4x64xf32>
    %c0_25 = arith.constant 0 : index
    %c0_26 = arith.constant 0 : index
    %22 = vector.load %arg8[%c0_25, %c0_26] : memref<64x64xf32, #tpu.memory_space<vmem>>, vector<64x64xf32>
    %cst_27 = arith.constant dense<0.000000e+00> : vector<4x64xf32>
    %23 = tpu.matmul %18, %22, %cst_27 {dimension_numbers = #tpu.dot_dimension_numbers<[1], [0], [0], [1], [0, 0, 1, 1], [], []>} : vector<4x64xf32>, vector<64x64xf32>, vector<4x64xf32> -> vector<4x64xf32>
    %c0_28 = arith.constant 0 : index
    %c0_29 = arith.constant 0 : index
    %24 = vector.load %arg8[%c0_28, %c0_29] : memref<64x64xf32, #tpu.memory_space<vmem>>, vector<64x64xf32>
    %cst_30 = arith.constant dense<0.000000e+00> : vector<4x64xf32>
    %25 = tpu.matmul %21, %24, %cst_30 {dimension_numbers = #tpu.dot_dimension_numbers<[1], [0], [0], [1], [0, 0, 1, 1], [], []>} : vector<4x64xf32>, vector<64x64xf32>, vector<4x64xf32> -> vector<4x64xf32>
    %26 = arith.mulf %23, %23 : vector<4x64xf32>
    %27 = arith.subf %25, %26 : vector<4x64xf32>
    %cst_31 = arith.constant 0.000000e+00 : f32
    %28 = vector.broadcast %cst_31 : f32 to vector<4x64xf32>
    %29 = arith.maximumf %27, %28 : vector<4x64xf32>
    %cst_32 = arith.constant 9.99999974E-6 : f32
    %30 = vector.broadcast %cst_32 : f32 to vector<4x64xf32>
    %31 = arith.addf %29, %30 : vector<4x64xf32>
    %32 = math.rsqrt %31 : vector<4x64xf32>
    %c0_33 = arith.constant 0 : index
    %c0_34 = arith.constant 0 : index
    %33 = vector.load %arg7[%c0_33, %c0_34] : memref<32x4xf32, #tpu.memory_space<vmem>>, vector<32x4xf32>
    %cst_35 = arith.constant dense<0.000000e+00> : vector<32x64xf32>
    %34 = tpu.matmul %33, %23, %cst_35 {dimension_numbers = #tpu.dot_dimension_numbers<[1], [0], [0], [1], [0, 0, 1, 1], [], []>} : vector<32x4xf32>, vector<4x64xf32>, vector<32x64xf32> -> vector<32x64xf32>
    %c0_36 = arith.constant 0 : index
    %c0_37 = arith.constant 0 : index
    %35 = vector.load %arg7[%c0_36, %c0_37] : memref<32x4xf32, #tpu.memory_space<vmem>>, vector<32x4xf32>
    %cst_38 = arith.constant dense<0.000000e+00> : vector<32x64xf32>
    %36 = tpu.matmul %35, %32, %cst_38 {dimension_numbers = #tpu.dot_dimension_numbers<[1], [0], [0], [1], [0, 0, 1, 1], [], []>} : vector<32x4xf32>, vector<4x64xf32>, vector<32x64xf32> -> vector<32x64xf32>
    %37 = arith.subf %16, %34 : vector<32x64xf32>
    %38 = arith.mulf %37, %36 : vector<32x64xf32>
    %c0_39 = arith.constant 0 : index
    %c0_40 = arith.constant 0 : index
    %39 = vector.load %arg4[%c0_39, %c0_40] : memref<1x64xf32, #tpu.memory_space<vmem>>, vector<1x64xf32>
    %40 = vector.broadcast %39 : vector<1x64xf32> to vector<32x64xf32>
    %41 = arith.mulf %38, %40 : vector<32x64xf32>
    %c0_41 = arith.constant 0 : index
    %c0_42 = arith.constant 0 : index
    %42 = vector.load %arg5[%c0_41, %c0_42] : memref<1x64xf32, #tpu.memory_space<vmem>>, vector<1x64xf32>
    %43 = vector.broadcast %42 : vector<1x64xf32> to vector<32x64xf32>
    %44 = arith.addf %41, %43 : vector<32x64xf32>
    %cst_43 = arith.constant 0.000000e+00 : f32
    %45 = vector.broadcast %cst_43 : f32 to vector<32x64xf32>
    %46 = arith.cmpf oge, %44, %45 : vector<32x64xf32>
    %cst_44 = arith.constant 1.000000e-01 : f32
    %47 = vector.broadcast %cst_44 : f32 to vector<32x64xf32>
    %48 = arith.mulf %47, %44 : vector<32x64xf32>
    %49 = arith.select %46, %44, %48 : vector<32x64xi1>, vector<32x64xf32>
    %c0_45 = arith.constant 0 : index
    %c0_46 = arith.constant 0 : index
    %50 = vector.load %arg9[%c0_45, %c0_46] : memref<32x64xf32, #tpu.memory_space<vmem>>, vector<32x64xf32>
    tpu.vector_store %arg9[%c0_45, %c0_46], %49 {strides = array<i32>} : memref<32x64xf32, #tpu.memory_space<vmem>>, vector<32x64xf32>,
    return
  }
  func.func @transform_0(%arg0: i32) -> (i32, i32) {
    %c0_i32 = arith.constant 0 : i32
    %c0_i32_0 = arith.constant 0 : i32
    return %arg0, %c0_i32 : i32, i32
  }
  func.func @transform_1(%arg0: i32) -> (i32, i32) {
    %c0_i32 = arith.constant 0 : i32
    %c0_i32_0 = arith.constant 0 : i32
    %c0_i32_1 = arith.constant 0 : i32
    return %c0_i32, %c0_i32_0 : i32, i32
  }
  func.func @transform_2(%arg0: i32) -> (i32, i32) {
    %c0_i32 = arith.constant 0 : i32
    %c0_i32_0 = arith.constant 0 : i32
    %c0_i32_1 = arith.constant 0 : i32
    return %c0_i32, %c0_i32_0 : i32, i32
  }
  func.func @transform_3(%arg0: i32) -> (i32, i32) {
    %c0_i32 = arith.constant 0 : i32
    %c0_i32_0 = arith.constant 0 : i32
    %c0_i32_1 = arith.constant 0 : i32
    return %c0_i32, %c0_i32_0 : i32, i32
  }
  func.func @transform_4(%arg0: i32) -> (i32, i32) {
    %c0_i32 = arith.constant 0 : i32
    %c0_i32_0 = arith.constant 0 : i32
    %c0_i32_1 = arith.constant 0 : i32
    return %c0_i32, %c0_i32_0 : i32, i32
  }
  func.func @transform_5(%arg0: i32) -> (i32, i32) {
    %c0_i32 = arith.constant 0 : i32
    %c0_i32_0 = arith.constant 0 : i32
    %c0_i32_1 = arith.constant 0 : i32
    return %c0_i32, %c0_i32_0 : i32, i32
  }
  func.func @transform_6(%arg0: i32) -> (i32, i32) {
    %c0_i32 = arith.constant 0 : i32
    %c0_i32_0 = arith.constant 0 : i32
    %c0_i32_1 = arith.constant 0 : i32
    return %c0_i32, %c0_i32_0 : i32, i32
  }
  func.func @transform_7(%arg0: i32) -> (i32, i32) {
    %c0_i32 = arith.constant 0 : i32
    %c0_i32_0 = arith.constant 0 : i32
    %c0_i32_1 = arith.constant 0 : i32
    return %c0_i32, %c0_i32_0 : i32, i32
  }
  func.func @transform_8(%arg0: i32) -> (i32, i32) {
    %c0_i32 = arith.constant 0 : i32
    %c0_i32_0 = arith.constant 0 : i32
    return %arg0, %c0_i32 : i32, i32
  }
}

module attributes {stable_mosaic.version = 11 : i64} {
  func.func @_up_conv_kernel(%arg0: i32, %arg1: memref<32x64xf32, #tpu.memory_space<vmem>>, %arg2: memref<64x32xf32, #tpu.memory_space<vmem>>, %arg3: memref<192x128xf32, #tpu.memory_space<vmem>>, %arg4: memref<1x128xf32, #tpu.memory_space<vmem>>, %arg5: memref<64x128xf32, #tpu.memory_space<vmem>>, %arg6: memref<4x18x64xf32, #tpu.memory_space<vmem>>) attributes {dimension_semantics = [#tpu.dimension_semantics<parallel>], iteration_bounds = array<i64: 2>, scalar_prefetch = 0 : i64, scratch_operands = 1 : i64, tpu.core_type = #tpu.core_type<tc>, window_params = [{transform_indices = @transform_0, window_bounds = array<i64: 32, 64>}, {pipeline_mode = #tpu.pipeline_mode<synchronous>, transform_indices = @transform_1, window_bounds = array<i64: 64, 32>}, {pipeline_mode = #tpu.pipeline_mode<synchronous>, transform_indices = @transform_2, window_bounds = array<i64: 192, 128>}, {pipeline_mode = #tpu.pipeline_mode<synchronous>, transform_indices = @transform_3, window_bounds = array<i64: 1, 128>}, {transform_indices = @transform_4, window_bounds = array<i64: 64, 128>}]} {
    %c0 = arith.constant 0 : index
    %c0_0 = arith.constant 0 : index
    %0 = vector.load %arg2[%c0, %c0_0] : memref<64x32xf32, #tpu.memory_space<vmem>>, vector<64x32xf32>
    %c0_1 = arith.constant 0 : index
    %c0_2 = arith.constant 0 : index
    %1 = vector.load %arg1[%c0_1, %c0_2] : memref<32x64xf32, #tpu.memory_space<vmem>>, vector<32x64xf32>
    %cst = arith.constant dense<0.000000e+00> : vector<64x64xf32>
    %2 = tpu.matmul %0, %1, %cst {dimension_numbers = #tpu.dot_dimension_numbers<[1], [0], [0], [1], [0, 0, 1, 1], [], []>} : vector<64x32xf32>, vector<32x64xf32>, vector<64x64xf32> -> vector<64x64xf32>
    %cst_3 = arith.constant 0.000000e+00 : f32
    %3 = vector.broadcast %cst_3 : f32 to vector<4x18x64xf32>
    %c0_4 = arith.constant 0 : index
    %c0_5 = arith.constant 0 : index
    %c0_6 = arith.constant 0 : index
    %4 = vector.load %arg6[%c0_4, %c0_5, %c0_6] : memref<4x18x64xf32, #tpu.memory_space<vmem>>, vector<4x18x64xf32>
    tpu.vector_store %arg6[%c0_4, %c0_5, %c0_6], %3 {strides = array<i32>} : memref<4x18x64xf32, #tpu.memory_space<vmem>>, vector<4x18x64xf32>,
    %5 = vector.shape_cast %2 : vector<64x64xf32> to vector<4x16x64xf32>
    %c0_7 = arith.constant 0 : index
    %c1 = arith.constant 1 : index
    %c0_8 = arith.constant 0 : index
    %6 = vector.load %arg6[%c0_7, %c1, %c0_8] : memref<4x18x64xf32, #tpu.memory_space<vmem>>, vector<4x16x64xf32>
    tpu.vector_store %arg6[%c0_7, %c1, %c0_8], %5 {strides = array<i32>} : memref<4x18x64xf32, #tpu.memory_space<vmem>>, vector<4x16x64xf32>,
    %c0_9 = arith.constant 0 : index
    %c0_10 = arith.constant 0 : index
    %c0_11 = arith.constant 0 : index
    %7 = vector.load %arg6[%c0_9, %c0_10, %c0_11] : memref<4x18x64xf32, #tpu.memory_space<vmem>>, vector<4x16x64xf32>
    %8 = vector.shape_cast %7 : vector<4x16x64xf32> to vector<64x64xf32>
    %c0_12 = arith.constant 0 : index
    %c1_13 = arith.constant 1 : index
    %c0_14 = arith.constant 0 : index
    %9 = vector.load %arg6[%c0_12, %c1_13, %c0_14] : memref<4x18x64xf32, #tpu.memory_space<vmem>>, vector<4x16x64xf32>
    %10 = vector.shape_cast %9 : vector<4x16x64xf32> to vector<64x64xf32>
    %c0_15 = arith.constant 0 : index
    %c2 = arith.constant 2 : index
    %c0_16 = arith.constant 0 : index
    %11 = vector.load %arg6[%c0_15, %c2, %c0_16] : memref<4x18x64xf32, #tpu.memory_space<vmem>>, vector<4x16x64xf32>
    %12 = vector.shape_cast %11 : vector<4x16x64xf32> to vector<64x64xf32>
    %13 = tpu.concatenate %8, %10, %12 in 1 : vector<64x64xf32>, vector<64x64xf32>, vector<64x64xf32> -> vector<64x192xf32>
    %c0_17 = arith.constant 0 : index
    %c0_18 = arith.constant 0 : index
    %14 = vector.load %arg3[%c0_17, %c0_18] : memref<192x128xf32, #tpu.memory_space<vmem>>, vector<192x128xf32>
    %cst_19 = arith.constant dense<0.000000e+00> : vector<64x128xf32>
    %15 = tpu.matmul %13, %14, %cst_19 {dimension_numbers = #tpu.dot_dimension_numbers<[1], [0], [0], [1], [0, 0, 1, 1], [], []>} : vector<64x192xf32>, vector<192x128xf32>, vector<64x128xf32> -> vector<64x128xf32>
    %c0_20 = arith.constant 0 : index
    %c0_21 = arith.constant 0 : index
    %16 = vector.load %arg4[%c0_20, %c0_21] : memref<1x128xf32, #tpu.memory_space<vmem>>, vector<1x128xf32>
    %17 = vector.broadcast %16 : vector<1x128xf32> to vector<64x128xf32>
    %18 = arith.addf %15, %17 : vector<64x128xf32>
    %c0_22 = arith.constant 0 : index
    %c0_23 = arith.constant 0 : index
    %19 = vector.load %arg5[%c0_22, %c0_23] : memref<64x128xf32, #tpu.memory_space<vmem>>, vector<64x128xf32>
    tpu.vector_store %arg5[%c0_22, %c0_23], %18 {strides = array<i32>} : memref<64x128xf32, #tpu.memory_space<vmem>>, vector<64x128xf32>,
    return
  }
  func.func @transform_0(%arg0: i32) -> (i32, i32) {
    %c0_i32 = arith.constant 0 : i32
    %c0_i32_0 = arith.constant 0 : i32
    return %arg0, %c0_i32 : i32, i32
  }
  func.func @transform_1(%arg0: i32) -> (i32, i32) {
    %c0_i32 = arith.constant 0 : i32
    %c0_i32_0 = arith.constant 0 : i32
    %c0_i32_1 = arith.constant 0 : i32
    return %c0_i32, %c0_i32_0 : i32, i32
  }
  func.func @transform_2(%arg0: i32) -> (i32, i32) {
    %c0_i32 = arith.constant 0 : i32
    %c0_i32_0 = arith.constant 0 : i32
    %c0_i32_1 = arith.constant 0 : i32
    return %c0_i32, %c0_i32_0 : i32, i32
  }
  func.func @transform_3(%arg0: i32) -> (i32, i32) {
    %c0_i32 = arith.constant 0 : i32
    %c0_i32_0 = arith.constant 0 : i32
    %c0_i32_1 = arith.constant 0 : i32
    return %c0_i32, %c0_i32_0 : i32, i32
  }
  func.func @transform_4(%arg0: i32) -> (i32, i32) {
    %c0_i32 = arith.constant 0 : i32
    %c0_i32_0 = arith.constant 0 : i32
    return %arg0, %c0_i32 : i32, i32
  }
}

module attributes {stable_mosaic.version = 11 : i64} {
  func.func @_conv_gn_leaky_kernel(%arg0: i32, %arg1: memref<64x128xf32, #tpu.memory_space<vmem>>, %arg2: memref<384x64xf32, #tpu.memory_space<vmem>>, %arg3: memref<1x64xf32, #tpu.memory_space<vmem>>, %arg4: memref<1x64xf32, #tpu.memory_space<vmem>>, %arg5: memref<1x64xf32, #tpu.memory_space<vmem>>, %arg6: memref<4x64xf32, #tpu.memory_space<vmem>>, %arg7: memref<64x4xf32, #tpu.memory_space<vmem>>, %arg8: memref<64x64xf32, #tpu.memory_space<vmem>>, %arg9: memref<64x64xf32, #tpu.memory_space<vmem>>, %arg10: memref<4x18x128xf32, #tpu.memory_space<vmem>>) attributes {dimension_semantics = [#tpu.dimension_semantics<parallel>], iteration_bounds = array<i64: 2>, scalar_prefetch = 0 : i64, scratch_operands = 1 : i64, tpu.core_type = #tpu.core_type<tc>, window_params = [{transform_indices = @transform_0, window_bounds = array<i64: 64, 128>}, {pipeline_mode = #tpu.pipeline_mode<synchronous>, transform_indices = @transform_1, window_bounds = array<i64: 384, 64>}, {pipeline_mode = #tpu.pipeline_mode<synchronous>, transform_indices = @transform_2, window_bounds = array<i64: 1, 64>}, {pipeline_mode = #tpu.pipeline_mode<synchronous>, transform_indices = @transform_3, window_bounds = array<i64: 1, 64>}, {pipeline_mode = #tpu.pipeline_mode<synchronous>, transform_indices = @transform_4, window_bounds = array<i64: 1, 64>}, {pipeline_mode = #tpu.pipeline_mode<synchronous>, transform_indices = @transform_5, window_bounds = array<i64: 4, 64>}, {pipeline_mode = #tpu.pipeline_mode<synchronous>, transform_indices = @transform_6, window_bounds = array<i64: 64, 4>}, {pipeline_mode = #tpu.pipeline_mode<synchronous>, transform_indices = @transform_7, window_bounds = array<i64: 64, 64>}, {transform_indices = @transform_8, window_bounds = array<i64: 64, 64>}]} {
    %cst = arith.constant 0.000000e+00 : f32
    %0 = vector.broadcast %cst : f32 to vector<4x18x128xf32>
    %c0 = arith.constant 0 : index
    %c0_0 = arith.constant 0 : index
    %c0_1 = arith.constant 0 : index
    %1 = vector.load %arg10[%c0, %c0_0, %c0_1] : memref<4x18x128xf32, #tpu.memory_space<vmem>>, vector<4x18x128xf32>
    tpu.vector_store %arg10[%c0, %c0_0, %c0_1], %0 {strides = array<i32>} : memref<4x18x128xf32, #tpu.memory_space<vmem>>, vector<4x18x128xf32>,
    %c0_2 = arith.constant 0 : index
    %c0_3 = arith.constant 0 : index
    %2 = vector.load %arg1[%c0_2, %c0_3] : memref<64x128xf32, #tpu.memory_space<vmem>>, vector<64x128xf32>
    %3 = vector.shape_cast %2 : vector<64x128xf32> to vector<4x16x128xf32>
    %c0_4 = arith.constant 0 : index
    %c1 = arith.constant 1 : index
    %c0_5 = arith.constant 0 : index
    %4 = vector.load %arg10[%c0_4, %c1, %c0_5] : memref<4x18x128xf32, #tpu.memory_space<vmem>>, vector<4x16x128xf32>
    tpu.vector_store %arg10[%c0_4, %c1, %c0_5], %3 {strides = array<i32>} : memref<4x18x128xf32, #tpu.memory_space<vmem>>, vector<4x16x128xf32>,
    %c0_6 = arith.constant 0 : index
    %c0_7 = arith.constant 0 : index
    %c0_8 = arith.constant 0 : index
    %5 = vector.load %arg10[%c0_6, %c0_7, %c0_8] : memref<4x18x128xf32, #tpu.memory_space<vmem>>, vector<4x16x128xf32>
    %6 = vector.shape_cast %5 : vector<4x16x128xf32> to vector<64x128xf32>
    %c0_9 = arith.constant 0 : index
    %c1_10 = arith.constant 1 : index
    %c0_11 = arith.constant 0 : index
    %7 = vector.load %arg10[%c0_9, %c1_10, %c0_11] : memref<4x18x128xf32, #tpu.memory_space<vmem>>, vector<4x16x128xf32>
    %8 = vector.shape_cast %7 : vector<4x16x128xf32> to vector<64x128xf32>
    %c0_12 = arith.constant 0 : index
    %c2 = arith.constant 2 : index
    %c0_13 = arith.constant 0 : index
    %9 = vector.load %arg10[%c0_12, %c2, %c0_13] : memref<4x18x128xf32, #tpu.memory_space<vmem>>, vector<4x16x128xf32>
    %10 = vector.shape_cast %9 : vector<4x16x128xf32> to vector<64x128xf32>
    %11 = tpu.concatenate %6, %8, %10 in 1 : vector<64x128xf32>, vector<64x128xf32>, vector<64x128xf32> -> vector<64x384xf32>
    %c0_14 = arith.constant 0 : index
    %c0_15 = arith.constant 0 : index
    %12 = vector.load %arg2[%c0_14, %c0_15] : memref<384x64xf32, #tpu.memory_space<vmem>>, vector<384x64xf32>
    %cst_16 = arith.constant dense<0.000000e+00> : vector<64x64xf32>
    %13 = tpu.matmul %11, %12, %cst_16 {dimension_numbers = #tpu.dot_dimension_numbers<[1], [0], [0], [1], [0, 0, 1, 1], [], []>} : vector<64x384xf32>, vector<384x64xf32>, vector<64x64xf32> -> vector<64x64xf32>
    %c0_17 = arith.constant 0 : index
    %c0_18 = arith.constant 0 : index
    %14 = vector.load %arg3[%c0_17, %c0_18] : memref<1x64xf32, #tpu.memory_space<vmem>>, vector<1x64xf32>
    %15 = vector.broadcast %14 : vector<1x64xf32> to vector<64x64xf32>
    %16 = arith.addf %13, %15 : vector<64x64xf32>
    %c0_19 = arith.constant 0 : index
    %c0_20 = arith.constant 0 : index
    %17 = vector.load %arg6[%c0_19, %c0_20] : memref<4x64xf32, #tpu.memory_space<vmem>>, vector<4x64xf32>
    %cst_21 = arith.constant dense<0.000000e+00> : vector<4x64xf32>
    %18 = tpu.matmul %17, %16, %cst_21 {dimension_numbers = #tpu.dot_dimension_numbers<[1], [0], [0], [1], [0, 0, 1, 1], [], []>} : vector<4x64xf32>, vector<64x64xf32>, vector<4x64xf32> -> vector<4x64xf32>
    %c0_22 = arith.constant 0 : index
    %c0_23 = arith.constant 0 : index
    %19 = vector.load %arg6[%c0_22, %c0_23] : memref<4x64xf32, #tpu.memory_space<vmem>>, vector<4x64xf32>
    %20 = arith.mulf %16, %16 : vector<64x64xf32>
    %cst_24 = arith.constant dense<0.000000e+00> : vector<4x64xf32>
    %21 = tpu.matmul %19, %20, %cst_24 {dimension_numbers = #tpu.dot_dimension_numbers<[1], [0], [0], [1], [0, 0, 1, 1], [], []>} : vector<4x64xf32>, vector<64x64xf32>, vector<4x64xf32> -> vector<4x64xf32>
    %c0_25 = arith.constant 0 : index
    %c0_26 = arith.constant 0 : index
    %22 = vector.load %arg8[%c0_25, %c0_26] : memref<64x64xf32, #tpu.memory_space<vmem>>, vector<64x64xf32>
    %cst_27 = arith.constant dense<0.000000e+00> : vector<4x64xf32>
    %23 = tpu.matmul %18, %22, %cst_27 {dimension_numbers = #tpu.dot_dimension_numbers<[1], [0], [0], [1], [0, 0, 1, 1], [], []>} : vector<4x64xf32>, vector<64x64xf32>, vector<4x64xf32> -> vector<4x64xf32>
    %c0_28 = arith.constant 0 : index
    %c0_29 = arith.constant 0 : index
    %24 = vector.load %arg8[%c0_28, %c0_29] : memref<64x64xf32, #tpu.memory_space<vmem>>, vector<64x64xf32>
    %cst_30 = arith.constant dense<0.000000e+00> : vector<4x64xf32>
    %25 = tpu.matmul %21, %24, %cst_30 {dimension_numbers = #tpu.dot_dimension_numbers<[1], [0], [0], [1], [0, 0, 1, 1], [], []>} : vector<4x64xf32>, vector<64x64xf32>, vector<4x64xf32> -> vector<4x64xf32>
    %26 = arith.mulf %23, %23 : vector<4x64xf32>
    %27 = arith.subf %25, %26 : vector<4x64xf32>
    %cst_31 = arith.constant 0.000000e+00 : f32
    %28 = vector.broadcast %cst_31 : f32 to vector<4x64xf32>
    %29 = arith.maximumf %27, %28 : vector<4x64xf32>
    %cst_32 = arith.constant 9.99999974E-6 : f32
    %30 = vector.broadcast %cst_32 : f32 to vector<4x64xf32>
    %31 = arith.addf %29, %30 : vector<4x64xf32>
    %32 = math.rsqrt %31 : vector<4x64xf32>
    %c0_33 = arith.constant 0 : index
    %c0_34 = arith.constant 0 : index
    %33 = vector.load %arg7[%c0_33, %c0_34] : memref<64x4xf32, #tpu.memory_space<vmem>>, vector<64x4xf32>
    %cst_35 = arith.constant dense<0.000000e+00> : vector<64x64xf32>
    %34 = tpu.matmul %33, %23, %cst_35 {dimension_numbers = #tpu.dot_dimension_numbers<[1], [0], [0], [1], [0, 0, 1, 1], [], []>} : vector<64x4xf32>, vector<4x64xf32>, vector<64x64xf32> -> vector<64x64xf32>
    %c0_36 = arith.constant 0 : index
    %c0_37 = arith.constant 0 : index
    %35 = vector.load %arg7[%c0_36, %c0_37] : memref<64x4xf32, #tpu.memory_space<vmem>>, vector<64x4xf32>
    %cst_38 = arith.constant dense<0.000000e+00> : vector<64x64xf32>
    %36 = tpu.matmul %35, %32, %cst_38 {dimension_numbers = #tpu.dot_dimension_numbers<[1], [0], [0], [1], [0, 0, 1, 1], [], []>} : vector<64x4xf32>, vector<4x64xf32>, vector<64x64xf32> -> vector<64x64xf32>
    %37 = arith.subf %16, %34 : vector<64x64xf32>
    %38 = arith.mulf %37, %36 : vector<64x64xf32>
    %c0_39 = arith.constant 0 : index
    %c0_40 = arith.constant 0 : index
    %39 = vector.load %arg4[%c0_39, %c0_40] : memref<1x64xf32, #tpu.memory_space<vmem>>, vector<1x64xf32>
    %40 = vector.broadcast %39 : vector<1x64xf32> to vector<64x64xf32>
    %41 = arith.mulf %38, %40 : vector<64x64xf32>
    %c0_41 = arith.constant 0 : index
    %c0_42 = arith.constant 0 : index
    %42 = vector.load %arg5[%c0_41, %c0_42] : memref<1x64xf32, #tpu.memory_space<vmem>>, vector<1x64xf32>
    %43 = vector.broadcast %42 : vector<1x64xf32> to vector<64x64xf32>
    %44 = arith.addf %41, %43 : vector<64x64xf32>
    %cst_43 = arith.constant 0.000000e+00 : f32
    %45 = vector.broadcast %cst_43 : f32 to vector<64x64xf32>
    %46 = arith.cmpf oge, %44, %45 : vector<64x64xf32>
    %cst_44 = arith.constant 1.000000e-01 : f32
    %47 = vector.broadcast %cst_44 : f32 to vector<64x64xf32>
    %48 = arith.mulf %47, %44 : vector<64x64xf32>
    %49 = arith.select %46, %44, %48 : vector<64x64xi1>, vector<64x64xf32>
    %c0_45 = arith.constant 0 : index
    %c0_46 = arith.constant 0 : index
    %50 = vector.load %arg9[%c0_45, %c0_46] : memref<64x64xf32, #tpu.memory_space<vmem>>, vector<64x64xf32>
    tpu.vector_store %arg9[%c0_45, %c0_46], %49 {strides = array<i32>} : memref<64x64xf32, #tpu.memory_space<vmem>>, vector<64x64xf32>,
    return
  }
  func.func @transform_0(%arg0: i32) -> (i32, i32) {
    %c0_i32 = arith.constant 0 : i32
    %c0_i32_0 = arith.constant 0 : i32
    return %arg0, %c0_i32 : i32, i32
  }
  func.func @transform_1(%arg0: i32) -> (i32, i32) {
    %c0_i32 = arith.constant 0 : i32
    %c0_i32_0 = arith.constant 0 : i32
    %c0_i32_1 = arith.constant 0 : i32
    return %c0_i32, %c0_i32_0 : i32, i32
  }
  func.func @transform_2(%arg0: i32) -> (i32, i32) {
    %c0_i32 = arith.constant 0 : i32
    %c0_i32_0 = arith.constant 0 : i32
    %c0_i32_1 = arith.constant 0 : i32
    return %c0_i32, %c0_i32_0 : i32, i32
  }
  func.func @transform_3(%arg0: i32) -> (i32, i32) {
    %c0_i32 = arith.constant 0 : i32
    %c0_i32_0 = arith.constant 0 : i32
    %c0_i32_1 = arith.constant 0 : i32
    return %c0_i32, %c0_i32_0 : i32, i32
  }
  func.func @transform_4(%arg0: i32) -> (i32, i32) {
    %c0_i32 = arith.constant 0 : i32
    %c0_i32_0 = arith.constant 0 : i32
    %c0_i32_1 = arith.constant 0 : i32
    return %c0_i32, %c0_i32_0 : i32, i32
  }
  func.func @transform_5(%arg0: i32) -> (i32, i32) {
    %c0_i32 = arith.constant 0 : i32
    %c0_i32_0 = arith.constant 0 : i32
    %c0_i32_1 = arith.constant 0 : i32
    return %c0_i32, %c0_i32_0 : i32, i32
  }
  func.func @transform_6(%arg0: i32) -> (i32, i32) {
    %c0_i32 = arith.constant 0 : i32
    %c0_i32_0 = arith.constant 0 : i32
    %c0_i32_1 = arith.constant 0 : i32
    return %c0_i32, %c0_i32_0 : i32, i32
  }
  func.func @transform_7(%arg0: i32) -> (i32, i32) {
    %c0_i32 = arith.constant 0 : i32
    %c0_i32_0 = arith.constant 0 : i32
    %c0_i32_1 = arith.constant 0 : i32
    return %c0_i32, %c0_i32_0 : i32, i32
  }
  func.func @transform_8(%arg0: i32) -> (i32, i32) {
    %c0_i32 = arith.constant 0 : i32
    %c0_i32_0 = arith.constant 0 : i32
    return %arg0, %c0_i32 : i32, i32
  }
}

</mosaic_0001>

<bundles_post_ra>
// kernel: decoder_forward.4
= control target key start
LH: loop header
LB: loop body
LE: loop exit
PB: predicated region body
PF: predicated region fallthrough
CT: control target
= control target key end

     0   :  { %s691_s15 = smov 0   ;;  %s843_s0 = inlined_call_operand.vmem [shape: f32[32,64], index: 0, kind: input, shape index: {}]   ;;  %s844_s1 = inlined_call_operand.vmem [shape: f32[32,16], index: 1, kind: input, shape index: {}]   ;;  %s845_s2 = inlined_call_operand.vmem [shape: f32[192,128], index: 2, kind: input, shape index: {}]   ;;  %s846_s3 = inlined_call_operand.vmem [shape: f32[1,128], index: 3, kind: input, shape index: {}]   ;;  %s847_s4 = inlined_call_operand.vmem [shape: f32[64,128], index: 4, kind: output, shape index: {}]  }
   0x1 LB: > { %s539_s16 = sadd.s32 4294967295, %s661_s15   ;;  %p543_p0 = scmp.ge.s32.totalorder %s661_s15, 1  ;;  %s661_s15 = sphi %s691_s15, %s14_s15  }
   0x2   : > { %p163_p1 = scmp.lt.s32.totalorder %s661_s15, 3 }
   0x4   : > { %p164_p2 = pnand %p543_p0, %p163_p1 }
   0x5   : > { %s544_s17 = sshll.u32 (!%p164_p2), %s539_s16, 1  ;;  %v201_v0 = vld [vmem:[%s844_s1] sm:$0xff] (!%p164_p2)  ;;  %vm207_vm0 = vcmask (!%p164_p2), 130048   ;;  %v202_v4 = vld [vmem:[%s844_s1 + $0x8] sm:$0xff] (!%p164_p2)  ;;  %v203_v5 = vld [vmem:[%s844_s1 + $0x10] sm:$0xff] (!%p164_p2)  ;;  %vm305_vm1 = vcmask (!%p164_p2), 523264  }
   0x6   : > { %167 = sbr.rel (%p164_p2) target bundleno = 587 (0x24b), region = 36  ;;  %p190_p3 = scmp.lt.s32.totalorder (!%p164_p2), %s544_s17, 3  ;;  %569 = vmatprep.mubr.msk.f32.mxu0 (!%p164_p2), %vm207_vm0, %v201_v0  ;;  %v204_v6 = vld [vmem:[%s844_s1 + $0x18] sm:$0xff] (!%p164_p2)  ;;  %vm307_vm2 = vcmask (!%p164_p2), 517120   ;;  %v663_v7 = vmov (!%p164_p2), 0.0   ;;  %v351_v8 = vld [vmem:[%s845_s2] sm:$0xff] (!%p164_p2) }
   0x7   : > { %309 = vst.msk [vmem:[#allocation2 + $0x10] sm:$0xff] (!%p164_p2), %vm305_vm1, %v663_v7  ;;  %306 = vst.msk [vmem:[#allocation2] sm:$0xff] (!%p164_p2), %vm305_vm1, %v663_v7  ;;  %v352_v9 = vld [vmem:[%s845_s2 + $0x8] sm:$0xff] (!%p164_p2)  ;;  %v353_v10 = vld [vmem:[%s845_s2 + $0x10] sm:$0xff] (!%p164_p2)  ;;  %v664_v11 = vmov (!%p164_p2), 0.0|0.0   ;;  %s665_s30 = smov (!%p164_p2), 64  }
   0x8   : > { %310 = vst.msk [vmem:[#allocation2 + $0x18] sm:$0x3] (!%p164_p2), %vm307_vm2, %v663_v7  ;;  %308 = vst.msk [vmem:[#allocation2 + $0x8] sm:$0x3] (!%p164_p2), %vm307_vm2, %v663_v7  ;;  %615 = vmatprep.subr.bf16.mxu1 (!%p164_p2), %v664_v11  ;;  %v580_v12 = vpack.c.bf16 (!%p164_p2), %v352_v9, %v351_v8  ;;  %v354_v13 = vld [vmem:[%s845_s2 + $0x18] sm:$0xff] (!%p164_p2)  ;;  %v355_v15 = vld [vmem:[%s845_s2 + $0x20] sm:$0xff] (!%p164_p2) }
   0x9   : > { %311 = vst.msk [vmem:[#allocation2 + $0x20] sm:$0xff] (!%p164_p2), %vm305_vm1, %v663_v7  ;;  %313 = vst.msk [vmem:[#allocation2 + $0x30] sm:$0xff] (!%p164_p2), %vm305_vm1, %v663_v7  ;;  %v583_v14 = vpack.c.bf16 (!%p164_p2), %v354_v13, %v353_v10  ;;  %v356_v16 = vld [vmem:[%s845_s2 + $0x28] sm:$0xff] (!%p164_p2)  ;;  %v357_v18 = vld [vmem:[%s845_s2 + $0x30] sm:$0xff] (!%p164_p2)  ;;  %s546_s5 = sshll.u32 (!%p164_p2), %s539_s16, 2 }
   0xa   : > { %312 = vst.msk [vmem:[#allocation2 + $0x28] sm:$0x3] (!%p164_p2), %vm307_vm2, %v663_v7  ;;  %314 = vst.msk [vmem:[#allocation2 + $0x38] sm:$0x3] (!%p164_p2), %vm307_vm2, %v663_v7  ;;  %627 = vmatpush1.bf16.msra.mxu1 (!%p164_p2), %v580_v12  ;;  %v586_v17 = vpack.c.bf16 (!%p164_p2), %v356_v16, %v355_v15  ;;  %v358_v19 = vld [vmem:[%s845_s2 + $0x38] sm:$0xff] (!%p164_p2)  ;;  %v359_v21 = vld [vmem:[%s845_s2 + $0x40] sm:$0xff] (!%p164_p2) }
   0xb   : > { %616 = vmatprep.subr.bf16.mxu1 (!%p164_p2), %v664_v11  ;;  %v589_v20 = vpack.c.bf16 (!%p164_p2), %v358_v19, %v357_v18  ;;  %v360_v22 = vld [vmem:[%s845_s2 + $0x48] sm:$0xff] (!%p164_p2)  ;;  %v361_v24 = vld [vmem:[%s845_s2 + $0x50] sm:$0xff] (!%p164_p2)  ;;  %v362_v25 = vld [vmem:[%s845_s2 + $0x58] sm:$0xff] (!%p164_p2)  ;;  %p196_p4 = scmp.lt.s32.totalorder (!%p164_p2), %s546_s5, 7 }
   0xc   : > { %v592_v23 = vpack.c.bf16 (!%p164_p2), %v360_v22, %v359_v21  ;;  %v595_v26 = vpack.c.bf16 (!%p164_p2), %v362_v25, %v361_v24  ;;  %v363_v27 = vld [vmem:[%s845_s2 + $0x60] sm:$0xff] (!%p164_p2)  ;;  %v364_v28 = vld [vmem:[%s845_s2 + $0x68] sm:$0xff] (!%p164_p2)  ;;  %v365_v30 = vld [vmem:[%s845_s2 + $0x70] sm:$0xff] (!%p164_p2) }
   0xd   : > { %s849_s17 = smov (!%p190_p3, %s544_s17), 3  ;;  %v598_v29 = vpack.c.bf16 %v364_v28, %v363_v27  ;;  %v366_v31 = vld [vmem:[%s845_s2 + $0x78] sm:$0xff]  ;;  %v367_v33 = vld [vmem:[%s845_s2 + $0x80] sm:$0xff]  ;;  %v368_v34 = vld [vmem:[%s845_s2 + $0x88] sm:$0xff]  ;;  %s851_s5 = smov (!%p196_p4, %s546_s5), 7 }
   0xe   : > { %s545_s20 = sshll.u32 %s849_s17, 3  ;;  %628 = vmatpush1.bf16.msra.mxu1 %v583_v14  ;;  %v601_v32 = vpack.c.bf16 %v366_v31, %v365_v30  ;;  %v604_v35 = vpack.c.bf16 %v368_v34, %v367_v33  ;;  %v369_v36 = vld [vmem:[%s845_s2 + $0x90] sm:$0xff]  ;;  %v370_v37 = vld [vmem:[%s845_s2 + $0x98] sm:$0xff]  ;;  %v371_v39 = vld [vmem:[%s845_s2 + $0xa0] sm:$0xff]  ;;  %s547_s6 = sshll.u32 %s851_s5, 3 }
   0xf   : > { %s193_s23 = scalar_lea.vmem %s843_s0, %s545_s20  ;;  %617 = vmatprep.subr.bf16.mxu1 %v664_v11  ;;  %v607_v38 = vpack.c.bf16 %v370_v37, %v369_v36  ;;  %v372_v40 = vld [vmem:[%s845_s2 + $0xa8] sm:$0xff]  ;;  %v373_v42 = vld [vmem:[%s845_s2 + $0xb0] sm:$0xff]  ;;  %v374_v43 = vld [vmem:[%s845_s2 + $0xb8] sm:$0xff]  ;;  %s199_s11 = scalar_lea.vmem %s847_s4, %s547_s6 }
  0x10   : > { %v205_v1 = vld [vmem:[%s193_s23] sm:$0xff]  ;;  %v206_v2 = vld [vmem:[%s193_s23 + $0x8] sm:$0xff]  ;;  %v610_v41 = vpack.c.bf16 %v372_v40, %v371_v39  ;;  %v613_v44 = vpack.c.bf16 %v374_v43, %v373_v42 }
  0x11   : > { %v575_v3 = vpack.c.bf16 %v206_v2, %v205_v1  ;;  %v552_v9 = vld [vmem:[%s846_s3] ss:$0 sm:$0xff] }
  0x12   : > { %629 = vmatpush1.bf16.msra.mxu1 %v586_v17 }
  0x13   : > { %576 = vmatprep.subr.bf16.mxu0 %v575_v3  ;;  %618 = vmatprep.subr.bf16.mxu1 %v664_v11 }
  0x14   : > { %578 = vmatpush3.bf16.msra.mxu0 %v575_v3 }
  0x15   : > { %579 = vmatprep.subr.bf16.mxu0 %v664_v11 }
  0x16   : > { %630 = vmatpush1.bf16.msra.mxu1 %v589_v20 }
  0x17   : > { %570 = vmatmul.mubr.msk.f32.vlgmr.msra.gmra.mrb[0].mxu0 %vm207_vm0, %v202_v4  ;;  %619 = vmatprep.subr.bf16.mxu1 %v664_v11 }
  0x18   : > { %572 = vmatprep.mubr.msk.f32.mxu0 %vm207_vm0, %v203_v5  ;;  %581 = vmatpush1.bf16.msra.mxu0 %v580_v12 }
  0x19   : > { %582 = vmatprep.subr.bf16.mxu0 %v664_v11 }
  0x1a   : > { %631 = vmatpush1.bf16.msra.mxu1 %v592_v23 }
  0x1b   : > { %573 = vmatmul.mubr.msk.f32.gmra.mrb[2].mxu0 %vm207_vm0, %v204_v6  ;;  %620 = vmatprep.subr.bf16.mxu1 %v664_v11 }
  0x1c   : > { %584 = vmatpush1.bf16.msra.mxu0 %v583_v14 }
  0x1d   : > { %585 = vmatprep.subr.bf16.mxu0 %v664_v11 }
  0x1e   : > { %632 = vmatpush1.bf16.msra.mxu1 %v595_v26 }
  0x1f   : > { %621 = vmatprep.subr.bf16.mxu1 %v664_v11 }
  0x20   : > { %587 = vmatpush1.bf16.msra.mxu0 %v586_v17 }
  0x21   : > { %588 = vmatprep.subr.bf16.mxu0 %v664_v11 }
  0x22   : > { %633 = vmatpush1.bf16.msra.mxu1 %v598_v29 }
  0x23   : > { %622 = vmatprep.subr.bf16.mxu1 %v664_v11 }
  0x24   : > { %590 = vmatpush1.bf16.msra.mxu0 %v589_v20 }
  0x25   : > { %591 = vmatprep.subr.bf16.mxu0 %v664_v11 }
  0x26   : > { %634 = vmatpush1.bf16.msra.mxu1 %v601_v32 }
  0x27   : > { %623 = vmatprep.subr.bf16.mxu1 %v664_v11 }
  0x28   : > { %593 = vmatpush1.bf16.msra.mxu0 %v592_v23 }
  0x29   : > { %594 = vmatprep.subr.bf16.mxu0 %v664_v11 }
  0x2a   : > { %635 = vmatpush1.bf16.msra.mxu1 %v604_v35 }
  0x2b   : > { %624 = vmatprep.subr.bf16.mxu1 %v664_v11 }
  0x2c   : > { %596 = vmatpush1.bf16.msra.mxu0 %v595_v26 }
  0x2d   : > { %597 = vmatprep.subr.bf16.mxu0 %v664_v11 }
  0x2e   : > { %636 = vmatpush1.bf16.msra.mxu1 %v607_v38 }
  0x2f   : > { %625 = vmatprep.subr.bf16.mxu1 %v664_v11 }
  0x30   : > { %599 = vmatpush1.bf16.msra.mxu0 %v598_v29 }
  0x31   : > { %600 = vmatprep.subr.bf16.mxu0 %v664_v11 }
  0x32   : > { %637 = vmatpush1.bf16.msra.mxu1 %v610_v41 }
  0x33   : > { %626 = vmatprep.subr.bf16.mxu1 %v664_v11 }
  0x34   : > { %602 = vmatpush1.bf16.msra.mxu0 %v601_v32 }
  0x35   : > { %603 = vmatprep.subr.bf16.mxu0 %v664_v11 }
  0x36   : > { %638 = vmatpush1.bf16.msra.mxu1 %v613_v44 }
  0x38   : > { %605 = vmatpush1.bf16.msra.mxu0 %v604_v35 }
  0x39   : > { %606 = vmatprep.subr.bf16.mxu0 %v664_v11 }
  0x3c   : > { %608 = vmatpush1.bf16.msra.mxu0 %v607_v38 }
  0x3d   : > { %609 = vmatprep.subr.bf16.mxu0 %v664_v11 }
  0x40   : > { %611 = vmatpush1.bf16.msra.mxu0 %v610_v41 }
  0x41   : > { %612 = vmatprep.subr.bf16.mxu0 %v664_v11 }
  0x44   : > { %614 = vmatpush1.bf16.msra.mxu0 %v613_v44 }
  0xea   : > { %v571_v45 = vpop.f32.mrb[0].mxu0 }
  0xeb   : > { %316 = vst.msk [vmem:[#allocation2 + $0x11] sm:$0xff] %vm305_vm1, %v571_v45  ;;  %v286_v46 = vpop.f32.mrb[1].mxu0 }
  0xec   : > { %315 = vst.msk [vmem:[#allocation2 + $0x1] sm:$0xff] %vm305_vm1, %v286_v46 }
  0xee   : > { %v574_v47 = vpop.f32.mrb[2].mxu0 }
  0xef   : > { %318 = vst.msk [vmem:[#allocation2 + $0x31] sm:$0xff] %vm305_vm1, %v574_v47  ;;  %v296_v48 = vpop.f32.mrb[3].mxu0 }
  0xf0   : > { %317 = vst.msk [vmem:[#allocation2 + $0x21] sm:$0xff] %vm305_vm1, %v296_v48 }
  0xf2   : > { %v328_v49 = vld [vmem:[#allocation2 + $0x12] sm:$0xff] }
  0xf3   : > { %v324_v50 = vld [vmem:[#allocation2 + $0x11] sm:$0xff]  ;;  %554 = vmatprep.mubr.msk.f32.mxu1 %vm305_vm1, %v328_v49  ;;  %v327_v51 = vld [vmem:[#allocation2 + $0x2] sm:$0xff] }
  0xf4   : > { %337 = vrot.lane.b32.xlu0 %v324_v50, %s665_s30  ;;  %553 = vmatprep.mubr.msk.f32.mxu0 %vm305_vm1, %v327_v51  ;;  %v323_v53 = vld [vmem:[#allocation2 + $0x1] sm:$0xff]  ;;  %v320_v57 = vld [vmem:[#allocation2 + $0x10] sm:$0xff] }
  0xf5   : > { %v319_v63 = vld [vmem:[#allocation2] sm:$0xff] }
  0xf6   : > { %v326_v52 = vld [vmem:[#allocation2 + $0x31] sm:$0xff] }
  0xf7   : > { %341 = vrot.lane.b32.xlu1 %v326_v52, %s665_s30  ;;  %v325_v54 = vld [vmem:[#allocation2 + $0x21] sm:$0xff]  ;;  %v330_v4 = vld [vmem:[#allocation2 + $0x32] sm:$0xff] }
  0xf8   : > { %v650_v55 = vpack.i.bf16 %v323_v53, %v325_v54  ;;  %v329_v59 = vld [vmem:[#allocation2 + $0x22] sm:$0xff]  ;;  %v322_v5 = vld [vmem:[#allocation2 + $0x30] sm:$0xff] }
  0xf9   : > { %v321_v0 = vld [vmem:[#allocation2 + $0x20] sm:$0xff] }
  0xfa   : > { %651 = vrot.lane.b32.xlu0 %v650_v55, %s665_s30 }
 0x166   : > { %v338_v56 = vpop.permute.xlu0 %337 }
 0x167   : > { %v348_v58 = vsel %vm305_vm1, %v320_v57, %v338_v56 }
 0x168   : > { %464 = vmatmul.mubr.f32.vlgmr.msra.gmra.mrb[0].mxu1 %v348_v58 }
 0x169   : > { %555 = vmatprep.mubr.msk.f32.mxu1 %vm305_vm1, %v329_v59  ;;  %v342_v3 = vpop.permute.xlu1 %341 }
 0x16a   : > { %v350_v6 = vsel %vm305_vm1, %v322_v5, %v342_v3 }
 0x16c   : > { %v652_v60 = vpop.permute.xlu0 %651 }
 0x16d   : > { %v654_v61 = vunpack.i.h.bf16 %v652_v60  ;;  %v653_v62 = vunpack.i.l.bf16 %v652_v60 }
 0x16f   : > { %v347_v1 = vsel %vm305_vm1, %v319_v63, %v654_v61  ;;  %v349_v2 = vsel %vm305_vm1, %v321_v0, %v653_v62 }
 0x170   : > { %459 = vmatmul.mubr.f32.vlgmr.msra.gmra.mrb[4].mxu0 %v347_v1  ;;  %469 = vmatmul.mubr.f32.gmra.mrb[2].mxu1 %v349_v2 }
 0x171   : > { %556 = vmatprep.mubr.msk.f32.mxu1 %vm305_vm1, %v330_v4 }
 0x174   : > { %474 = vmatmul.mubr.f32.gmra.mrb[4].mxu1 %v350_v6 }
 0x23b   : > { %v465_v7 = vpop.f32.mrb[0].mxu1 }
 0x23c   : > { %v467_v8 = vpop.f32.mrb[1].mxu1  ;;  %v466_v15 = vadd.f32 %v552_v9, %v465_v7 }
 0x23e   : > { %480 = vst [vmem:[%s199_s11 + $0x8] sm:$0xff] %v466_v15 }
 0x243   : > { %v460_v10 = vpop.f32.mrb[4].mxu0  ;;  %v470_v11 = vpop.f32.mrb[2].mxu1 }
 0x244   : > { %v461_v12 = vadd.f32 %v552_v9, %v460_v10  ;;  %v462_v13 = vpop.f32.mrb[5].mxu0  ;;  %v472_v14 = vpop.f32.mrb[3].mxu1  ;;  %v471_v16 = vadd.f32 %v552_v9, %v470_v11 }
 0x246   : > { %479 = vst [vmem:[%s199_s11] sm:$0xff] %v461_v12  ;;  %481 = vst [vmem:[%s199_s11 + $0x10] sm:$0xff] %v471_v16 }
 0x247   : > { %v475_v17 = vpop.f32.mrb[4].mxu1 }
 0x248   : > { %v476_v18 = vadd.f32 %v552_v9, %v475_v17  ;;  %v477_v19 = vpop.f32.mrb[5].mxu1 }
 0x24a   : > { %482 = vst [vmem:[%s199_s11 + $0x18] sm:$0xff] %v476_v18 }
 0x24b PF: > { %s14_s15 = sadd.s32 1, %s661_s15  }
 0x24c   : > { %p11_p5 = scmp.ge.s32.totalorder %s14_s15, 4  }
 0x24e   :  { %13 = sbr.rel (!%p11_p5) target bundleno = 1 (0x1), region = 66 }

// kernel: decoder_forward.5
= control target key start
LH: loop header
LB: loop body
LE: loop exit
PB: predicated region body
PF: predicated region fallthrough
CT: control target
= control target key end

     0   :  { %s1582_s27 = smov 0   ;;  %s1876_s0 = inlined_call_operand.vmem [shape: f32[64,128], index: 0, kind: input, shape index: {}]   ;;  %s1877_s1 = inlined_call_operand.vmem [shape: f32[384,64], index: 1, kind: input, shape index: {}]   ;;  %s1878_s2 = inlined_call_operand.vmem [shape: f32[1,64], index: 2, kind: input, shape index: {}]   ;;  %s1879_s3 = inlined_call_operand.vmem [shape: f32[1,64], index: 3, kind: input, shape index: {}]   ;;  %s1880_s4 = inlined_call_operand.vmem [shape: f32[1,64], index: 4, kind: input, shape index: {}]   ;;  %s1881_s5 = inlined_call_operand.vmem [shape: f32[4,32], index: 5, kind: input, shape index: {}]   ;;  %s1882_s6 = inlined_call_operand.vmem [shape: f32[32,4], index: 6, kind: input, shape index: {}]   ;;  %s1883_s7 = inlined_call_operand.vmem [shape: f32[64,64], index: 7, kind: input, shape index: {}]   ;;  %s1884_s8 = inlined_call_operand.vmem [shape: f32[64,64], index: 8, kind: output, shape index: {}]  }
   0x1 LB: > { %s1167_s28 = sadd.s32 4294967295, %s1532_s27   ;;  %p1171_p0 = scmp.ge.s32.totalorder %s1532_s27, 1  ;;  %s1532_s27 = sphi %s1582_s27, %s18_s27  }
   0x2   : > { %p263_p1 = scmp.lt.s32.totalorder %s1532_s27, 3 }
   0x4   : > { %p264_p2 = pnand %p1171_p0, %p263_p1 }
   0x5   : > { %v353_v0 = vld [vmem:[%s1877_s1 + $0x80] sm:$0xff] (!%p264_p2)  ;;  %v354_v1 = vld [vmem:[%s1877_s1 + $0x88] sm:$0xff] (!%p264_p2)  ;;  %s1599_s13 = sshll.u32 (!%p264_p2), %s1167_s28, 2  ;;  %v355_v5 = vld [vmem:[%s1877_s1 + $0x90] sm:$0xff] (!%p264_p2)  ;;  %v1534_v7 = vmov (!%p264_p2), 0.0   ;;  %vm1536_vm0 = vmmov (!%p264_p2), 0  }
   0x6   : > { %267 = sbr.rel (%p264_p2) target bundleno = 944 (0x3b0), region = 52  ;;  %v337_v2 = vld [vmem:[%s1877_s1] sm:$0xff] (!%p264_p2)  ;;  %v1411_v3 = vpack.c.bf16 (!%p264_p2), %v354_v1, %v353_v0  ;;  %v338_v4 = vld [vmem:[%s1877_s1 + $0x8] sm:$0xff] (!%p264_p2)  ;;  %v356_v6 = vld [vmem:[%s1877_s1 + $0x98] sm:$0xff] (!%p264_p2)  ;;  %p298_p3 = scmp.lt.s32.totalorder (!%p264_p2), %s1599_s13, 7  ;;  %309 = vst [vmem:[#allocation2] sm:$0xff] (!%p264_p2), %v1534_v7 }
   0x7   : > { %310 = vst [vmem:[#allocation2 + $0x8] sm:$0x3] (!%p264_p2), %v1534_v7  ;;  %311 = vst [vmem:[#allocation2 + $0x10] sm:$0xff] (!%p264_p2), %v1534_v7  ;;  %v1413_v8 = vpack.c.bf16 (!%p264_p2), %v338_v4, %v337_v2  ;;  %v1415_v9 = vpack.c.bf16 (!%p264_p2), %v356_v6, %v355_v5  ;;  %v369_v10 = vld [vmem:[%s1877_s1 + $0x100] sm:$0xff] (!%p264_p2)  ;;  %v370_v11 = vld [vmem:[%s1877_s1 + $0x108] sm:$0xff] (!%p264_p2)  ;;  %vm563_vm1 = vcmask (!%p264_p2), 261120  }
   0x8   : > { %312 = vst [vmem:[#allocation2 + $0x18] sm:$0x3] (!%p264_p2), %v1534_v7  ;;  %313 = vst [vmem:[#allocation2 + $0x20] sm:$0xff] (!%p264_p2), %v1534_v7  ;;  %v339_v12 = vld [vmem:[%s1877_s1 + $0x10] sm:$0xff] (!%p264_p2)  ;;  %1412 = vmatprep.subr.bf16.mxu0 (!%p264_p2), %v1411_v3  ;;  %v1443_v13 = vpack.c.bf16 (!%p264_p2), %v370_v11, %v369_v10  ;;  %v340_v14 = vld [vmem:[%s1877_s1 + $0x18] sm:$0xff] (!%p264_p2)  ;;  %vm719_vm2 = vcmask (!%p264_p2), 523264  }
   0x9   : > { %314 = vst [vmem:[#allocation2 + $0x28] sm:$0x3] (!%p264_p2), %v1534_v7  ;;  %315 = vst [vmem:[#allocation2 + $0x30] sm:$0xff] (!%p264_p2), %v1534_v7  ;;  %v357_v15 = vld [vmem:[%s1877_s1 + $0xa0] sm:$0xff] (!%p264_p2)  ;;  %v358_v16 = vld [vmem:[%s1877_s1 + $0xa8] sm:$0xff] (!%p264_p2)  ;;  %1414 = vmatpush3.bf16.msra.mxu0 (!%p264_p2), %v1413_v8  ;;  %v1417_v17 = vpack.c.bf16 (!%p264_p2), %v340_v14, %v339_v12  ;;  %vm875_vm3 = vcmask (!%p264_p2), 31744  }
   0xa   : > { %316 = vst [vmem:[#allocation2 + $0x38] sm:$0x3] (!%p264_p2), %v1534_v7  ;;  %v371_v18 = vld [vmem:[%s1877_s1 + $0x110] sm:$0xff] (!%p264_p2)  ;;  %v372_v19 = vld [vmem:[%s1877_s1 + $0x118] sm:$0xff] (!%p264_p2)  ;;  %1416 = vmatprep.subr.bf16.mxu0 (!%p264_p2), %v1415_v9  ;;  %1444 = vmatprep.subr.bf16.mxu1 (!%p264_p2), %v1443_v13  ;;  %v1419_v20 = vpack.c.bf16 (!%p264_p2), %v358_v16, %v357_v15  ;;  %v341_v22 = vld [vmem:[%s1877_s1 + $0x20] sm:$0xff] (!%p264_p2)  ;;  %vm888_vm4 = vcmask (!%p264_p2), 1043456  }
   0xb   : > { %v1447_v21 = vpack.c.bf16 (!%p264_p2), %v372_v19, %v371_v18  ;;  %v342_v23 = vld [vmem:[%s1877_s1 + $0x28] sm:$0xff] (!%p264_p2)  ;;  %v359_v24 = vld [vmem:[%s1877_s1 + $0xb0] sm:$0xff] (!%p264_p2)  ;;  %1446 = vmatpush3.bf16.msra.mxu1 (!%p264_p2), %v1443_v13  ;;  %v360_v25 = vld [vmem:[%s1877_s1 + $0xb8] sm:$0xff] (!%p264_p2) }
   0xc   : > { %v373_v26 = vld [vmem:[%s1877_s1 + $0x120] sm:$0xff] (!%p264_p2)  ;;  %v374_v27 = vld [vmem:[%s1877_s1 + $0x128] sm:$0xff] (!%p264_p2)  ;;  %v1421_v29 = vpack.c.bf16 (!%p264_p2), %v342_v23, %v341_v22  ;;  %v375_v30 = vld [vmem:[%s1877_s1 + $0x130] sm:$0xff] (!%p264_p2)  ;;  %v1423_v32 = vpack.c.bf16 (!%p264_p2), %v360_v25, %v359_v24  ;;  %v1535_v22 = vmov (!%p264_p2), 0.0|0.0  }
   0xd   : > { %s1886_s13 = smov (!%p298_p3, %s1599_s13), 7  ;;  %1448 = vmatprep.subr.bf16.mxu1 %v1447_v21  ;;  %v1451_v28 = vpack.c.bf16 %v374_v27, %v373_v26  ;;  %1418 = vmatpush3.bf16.msra.mxu0 %v1417_v17  ;;  %v376_v31 = vld [vmem:[%s1877_s1 + $0x138] sm:$0xff]  ;;  %v343_v33 = vld [vmem:[%s1877_s1 + $0x30] sm:$0xff]  ;;  %v361_v35 = vld [vmem:[%s1877_s1 + $0xc0] sm:$0xff] }
   0xe   : > { %1420 = vmatprep.subr.bf16.mxu0 %v1419_v20  ;;  %v344_v34 = vld [vmem:[%s1877_s1 + $0x38] sm:$0xff]  ;;  %s1173_s16 = sshll.u32 %s1886_s13, 3  ;;  %v362_v36 = vld [vmem:[%s1877_s1 + $0xc8] sm:$0xff]  ;;  %v1455_v37 = vpack.c.bf16 %v376_v31, %v375_v30  ;;  %v377_v39 = vld [vmem:[%s1877_s1 + $0x140] sm:$0xff] }
   0xf   : > { %1450 = vmatpush3.bf16.msra.mxu1 %v1447_v21  ;;  %v1425_v38 = vpack.c.bf16 %v344_v34, %v343_v33  ;;  %v378_v40 = vld [vmem:[%s1877_s1 + $0x148] sm:$0xff]  ;;  %s301_s28 = scalar_lea.vmem %s1876_s0, %s1173_s16  ;;  %v1427_v41 = vpack.c.bf16 %v362_v36, %v361_v35  ;;  %v345_v42 = vld [vmem:[%s1877_s1 + $0x40] sm:$0xff]  ;;  %v363_v44 = vld [vmem:[%s1877_s1 + $0xd0] sm:$0xff]  ;;  %s307_s26 = scalar_lea.vmem %s1884_s8, %s1173_s16 }
  0x10   : > { %1452 = vmatprep.subr.bf16.mxu1 %v1451_v28  ;;  %v346_v43 = vld [vmem:[%s1877_s1 + $0x48] sm:$0xff]  ;;  %v364_v45 = vld [vmem:[%s1877_s1 + $0xd8] sm:$0xff]  ;;  %v1459_v46 = vpack.c.bf16 %v378_v40, %v377_v39  ;;  %v379_v47 = vld [vmem:[%s1877_s1 + $0x150] sm:$0xff] }
  0x11   : > { %1422 = vmatpush3.bf16.msra.mxu0 %v1421_v29  ;;  %v317_v48 = vld [vmem:[%s301_s28] sm:$0xff]  ;;  %v1429_v49 = vpack.c.bf16 %v346_v43, %v345_v42  ;;  %v380_v50 = vld [vmem:[%s1877_s1 + $0x158] sm:$0xff]  ;;  %v318_v51 = vld [vmem:[%s301_s28 + $0x8] sm:$0xff]  ;;  %v1431_v53 = vpack.c.bf16 %v364_v45, %v363_v44 }
  0x12   : > { %1424 = vmatprep.subr.bf16.mxu0 %v1423_v32  ;;  %321 = vst [vmem:[#allocation2 + $0x1] sm:$0xff] %v317_v48  ;;  %456 = vmatprep.mubr.f32.mxu0 %v317_v48  ;;  %v319_v52 = vld [vmem:[%s301_s28 + $0x10] sm:$0xff]  ;;  %v348_v55 = vld [vmem:[%s1877_s1 + $0x58] sm:$0xff]  ;;  %322 = vst [vmem:[#allocation2 + $0x11] sm:$0xff] %v318_v51  ;;  %v1463_v59 = vpack.c.bf16 %v380_v50, %v379_v47 }
  0x13   : > { %1454 = vmatpush3.bf16.msra.mxu1 %v1451_v28  ;;  %v347_v54 = vld [vmem:[%s1877_s1 + $0x50] sm:$0xff]  ;;  %323 = vst [vmem:[#allocation2 + $0x21] sm:$0xff] %v319_v52  ;;  %v320_v56 = vld [vmem:[%s301_s28 + $0x18] sm:$0xff]  ;;  %v365_v57 = vld [vmem:[%s1877_s1 + $0xe0] sm:$0xff] }
  0x14   : > { %1456 = vmatprep.subr.bf16.mxu1 %v1455_v37  ;;  %v366_v58 = vld [vmem:[%s1877_s1 + $0xe8] sm:$0xff]  ;;  %324 = vst [vmem:[#allocation2 + $0x31] sm:$0xff] %v320_v56  ;;  %v1433_v60 = vpack.c.bf16 %v348_v55, %v347_v54  ;;  %v381_v61 = vld [vmem:[%s1877_s1 + $0x160] sm:$0xff]  ;;  %v367_v2 = vld [vmem:[%s1877_s1 + $0xf0] sm:$0xff] }
  0x15   : > { %1426 = vmatpush3.bf16.msra.mxu0 %v1425_v38  ;;  %v382_v62 = vld [vmem:[%s1877_s1 + $0x168] sm:$0xff]  ;;  %v1435_v63 = vpack.c.bf16 %v366_v58, %v365_v57  ;;  %v349_v0 = vld [vmem:[%s1877_s1 + $0x60] sm:$0xff]  ;;  %v368_v3 = vld [vmem:[%s1877_s1 + $0xf8] sm:$0xff] }
  0x16   : > { %1428 = vmatprep.subr.bf16.mxu0 %v1427_v41  ;;  %v350_v1 = vld [vmem:[%s1877_s1 + $0x68] sm:$0xff]  ;;  %v1467_v4 = vpack.c.bf16 %v382_v62, %v381_v61  ;;  %v383_v8 = vld [vmem:[%s1877_s1 + $0x170] sm:$0xff]  ;;  %v384_v9 = vld [vmem:[%s1877_s1 + $0x178] sm:$0xff]  ;;  %v1439_v10 = vpack.c.bf16 %v368_v3, %v367_v2 }
  0x17   : > { %1458 = vmatpush3.bf16.msra.mxu1 %v1455_v37  ;;  %v1437_v6 = vpack.c.bf16 %v350_v1, %v349_v0  ;;  %v351_v11 = vld [vmem:[%s1877_s1 + $0x70] sm:$0xff]  ;;  %v352_v12 = vld [vmem:[%s1877_s1 + $0x78] sm:$0xff]  ;;  %v1471_v13 = vpack.c.bf16 %v384_v9, %v383_v8  ;;  %v1176_v25 = vld [vmem:[%s1878_s2] ss:$0 sm:$0xff] }
  0x18   : > { %1460 = vmatprep.subr.bf16.mxu1 %v1459_v46  ;;  %v1441_v14 = vpack.c.bf16 %v352_v12, %v351_v11  ;;  %v562_v58 = vld [vmem:[%s1881_s5] sm:$0xf]  ;;  %v714_v61 = vld [vmem:[%s1883_s7 + $0x18] sm:$0xff]  ;;  %v716_v0 = vld [vmem:[%s1883_s7 + $0x28] sm:$0xff] }
  0x19   : > { %1430 = vmatpush3.bf16.msra.mxu0 %v1429_v49  ;;  %v333_v5 = vld [vmem:[#allocation2 + $0x2] sm:$0xff]  ;;  %v334_v16 = vld [vmem:[#allocation2 + $0x12] sm:$0xff] }
  0x1a   : > { %1432 = vmatprep.subr.bf16.mxu0 %v1431_v53  ;;  %1329 = vmatprep.mubr.f32.mxu1 %v333_v5  ;;  %v325_v15 = vld [vmem:[#allocation2] sm:$0xff]  ;;  %v326_v18 = vld [vmem:[#allocation2 + $0x10] sm:$0xff]  ;;  %v712_v53 = vld [vmem:[%s1883_s7 + $0x8] sm:$0xff] }
  0x1b   : > { %1462 = vmatpush3.bf16.msra.mxu1 %v1459_v46  ;;  %v335_v17 = vld [vmem:[#allocation2 + $0x22] sm:$0xff]  ;;  %v336_v19 = vld [vmem:[#allocation2 + $0x32] sm:$0xff] }
  0x1c   : > { %1464 = vmatprep.subr.bf16.mxu1 %v1463_v59  ;;  %v327_v20 = vld [vmem:[#allocation2 + $0x20] sm:$0xff]  ;;  %v328_v21 = vld [vmem:[#allocation2 + $0x30] sm:$0xff]  ;;  %v718_v3 = vld [vmem:[%s1883_s7 + $0x38] sm:$0xff] }
  0x1d   : > { %1434 = vmatpush3.bf16.msra.mxu0 %v1433_v60  ;;  %v713_v60 = vld [vmem:[%s1883_s7 + $0x10] sm:$0xff]  ;;  %v871_v9 = vld [vmem:[%s1882_s6] sm:$0xff]  ;;  %v872_v11 = vld [vmem:[%s1882_s6 + $0x8] sm:$0xff] }
  0x1e   : > { %1436 = vmatprep.subr.bf16.mxu0 %v1435_v63  ;;  %v1491_v62 = vpack.c.bf16 %v714_v61, %v713_v60  ;;  %v715_v63 = vld [vmem:[%s1883_s7 + $0x20] sm:$0xff]  ;;  %v717_v2 = vld [vmem:[%s1883_s7 + $0x30] sm:$0xff] }
  0x1f   : > { %1466 = vmatpush3.bf16.msra.mxu1 %v1463_v59  ;;  %v1494_v1 = vpack.c.bf16 %v716_v0, %v715_v63 }
  0x20   : > { %1468 = vmatprep.subr.bf16.mxu1 %v1467_v4 }
  0x21   : > { %1438 = vmatpush3.bf16.msra.mxu0 %v1437_v6 }
  0x22   : > { %1440 = vmatprep.subr.bf16.mxu0 %v1439_v10 }
  0x23   : > { %1470 = vmatpush3.bf16.msra.mxu1 %v1467_v4  ;;  %v1497_v4 = vpack.c.bf16 %v718_v3, %v717_v2 }
  0x24   : > { %1472 = vmatprep.subr.bf16.mxu1 %v1471_v13 }
  0x25   : > { %1442 = vmatpush3.bf16.msra.mxu0 %v1441_v14  ;;  %v873_v14 = vld [vmem:[%s1882_s6 + $0x10] sm:$0xff] }
  0x26   : > { %1481 = vmatprep.subr.bf16.mxu0 %v1535_v22 }
  0x27   : > { %1474 = vmatpush3.bf16.msra.mxu1 %v1471_v13 }
  0x28   : > { %457 = vmatmul.mubr.f32.vlgmr.msra.gmra.mrb[0].mxu0 %v325_v15  ;;  %1475 = vmatprep.subr.bf16.mxu1 %v1535_v22 }
  0x29   : > { %461 = vmatprep.mubr.f32.mxu0 %v318_v51 }
  0x2a   : > { %1330 = vmatmul.mubr.f32.vlgmr.msra.gmra.mrb[0].mxu1 %v334_v16 }
  0x2b   : > { %1332 = vmatprep.mubr.f32.mxu1 %v335_v17 }
  0x2c   : > { %462 = vmatmul.mubr.f32.gmra.mrb[2].mxu0 %v326_v18  ;;  %v874_v18 = vld [vmem:[%s1882_s6 + $0x18] sm:$0xff] }
  0x2d   : > { %466 = vmatprep.mubr.f32.mxu0 %v319_v52  ;;  %v711_v52 = vld [vmem:[%s1883_s7] sm:$0xff] }
  0x2e   : > { %1333 = vmatmul.mubr.f32.gmra.mrb[2].mxu1 %v336_v19  ;;  %v1488_v59 = vpack.c.bf16 %v712_v53, %v711_v52 }
  0x2f   : > { %1343 = vmatprep.mubr.msk.f32.mxu1 %vm1536_vm0, %v1534_v7 }
  0x30   : > { %467 = vmatmul.mubr.f32.gmra.mrb[4].mxu0 %v327_v20 }
  0x31   : > { %471 = vmatprep.mubr.f32.mxu0 %v320_v56 }
  0x34   : > { %472 = vmatmul.mubr.f32.gmra.mrb[6].mxu0 %v328_v21 }
  0x35   : > { %1354 = vmatprep.mubr.msk.f32.mxu0 %vm1536_vm0, %v1534_v7 }
  0xfb   : > { %v1227_v23 = vpop.f32.mrb[0].mxu0 }
  0xfc   : > { %v1228_v24 = vpop.f32.mrb[1].mxu0 }
  0xfd   : > { %v1229_v26 = vadd.f32 %v1228_v24, %v1227_v23  ;;  %v1331_v27 = vpop.f32.mrb[0].mxu1 }
  0xfe   : > { %v543_v28 = vpop.f32.mrb[1].mxu1 }
  0xff   : > { %v1230_v29 = vpop.f32.mrb[2].mxu0  ;;  %v459_v30 = vadd.f32 %v1229_v26, %v1176_v25 }
 0x100   : > { %v1231_v31 = vpop.f32.mrb[3].mxu0 }
 0x101   : > { %v1232_v32 = vadd.f32 %v1231_v31, %v1230_v29  ;;  %v1765_v33 = vadd.f32 %v543_v28, %v459_v30  ;;  %v1334_v34 = vpop.f32.mrb[2].mxu1  ;;  %v1191_v31 = vld [vmem:[%s1879_s3] ss:$0 sm:$0xff] }
 0x102   : > { %v553_v35 = vpop.f32.mrb[3].mxu1 }
 0x103   : > { %v464_v36 = vadd.f32 %v1232_v32, %v1176_v25  ;;  %v1233_v37 = vpop.f32.mrb[4].mxu0  ;;  %v637_v42 = vmul.f32 %v1765_v33, %v1765_v33 }
 0x104   : > { %v1234_v38 = vpop.f32.mrb[5].mxu0 }
 0x105   : > { %v1767_v39 = vadd.f32 %v1331_v27, %v464_v36  ;;  %v1235_v40 = vadd.f32 %v1234_v38, %v1233_v37  ;;  %v1192_v38 = vld [vmem:[%s1880_s4] ss:$0 sm:$0xff] }
 0x107   : > { %v1476_v41 = vpack.c.bf16 %v1767_v39, %v1765_v33  ;;  %v638_v43 = vmul.f32 %v1767_v39, %v1767_v39  ;;  %v1236_v44 = vpop.f32.mrb[6].mxu0  ;;  %v469_v45 = vadd.f32 %v1235_v40, %v1176_v25 }
 0x108   : > { %v1237_v46 = vpop.f32.mrb[7].mxu0 }
 0x109   : > { %v1482_v47 = vpack.c.bf16 %v638_v43, %v637_v42  ;;  %v1238_v48 = vadd.f32 %v1237_v46, %v1236_v44  ;;  %v1775_v49 = vadd.f32 %v553_v35, %v469_v45  ;;  %1477 = vmatpush3.bf16.msra.mxu1 %v1476_v41 }
 0x10a   : > { %1478 = vmatprep.subr.bf16.mxu1 %v1535_v22 }
 0x10b   : > { %v474_v50 = vadd.f32 %v1238_v48, %v1176_v25  ;;  %1483 = vmatpush3.bf16.msra.mxu0 %v1482_v47  ;;  %v639_v55 = vmul.f32 %v1775_v49, %v1775_v49 }
 0x10c   : > { %1484 = vmatprep.subr.bf16.mxu0 %v1535_v22 }
 0x10d   : > { %v1779_v51 = vadd.f32 %v1334_v34, %v474_v50 }
 0x10f   : > { %v1479_v54 = vpack.c.bf16 %v1779_v51, %v1775_v49  ;;  %v640_v56 = vmul.f32 %v1779_v51, %v1779_v51 }
 0x111   : > { %v1485_v57 = vpack.c.bf16 %v640_v56, %v639_v55  ;;  %1480 = vmatpush3.bf16.msra.mxu1 %v1479_v54 }
 0x112   : > { %1487 = vmatprep.subr.bf16.mxu1 %v1535_v22 }
 0x113   : > { %1486 = vmatpush3.bf16.msra.mxu0 %v1485_v57 }
 0x114   : > { %1344 = vmatmul.mubr.msk.f32.vlgmr.msra.gmra.mrb[4].mxu1 %vm563_vm1, %v562_v58  ;;  %1499 = vmatprep.subr.bf16.mxu0 %v1535_v22 }
 0x115   : > { %1489 = vmatpush3.bf16.msra.mxu1 %v1488_v59  ;;  %1373 = vmatprep.mubr.msk.f32.mxu1 %vm1536_vm0, %v1534_v7 }
 0x116   : > { %1355 = vmatmul.mubr.msk.f32.vlgmr.msra.gmra.mrb[8].mxu0 %vm563_vm1, %v562_v58  ;;  %1490 = vmatprep.subr.bf16.mxu1 %v1535_v22 }
 0x117   : > { %1501 = vmatpush3.bf16.msra.mxu0 %v1488_v59  ;;  %1392 = vmatprep.mubr.msk.f32.mxu0 %vm1536_vm0, %v1534_v7 }
 0x118   : > { %1502 = vmatprep.subr.bf16.mxu0 %v1535_v22 }
 0x119   : > { %1492 = vmatpush3.bf16.msra.mxu1 %v1491_v62 }
 0x11a   : > { %1493 = vmatprep.subr.bf16.mxu1 %v1535_v22 }
 0x11b   : > { %1504 = vmatpush3.bf16.msra.mxu0 %v1491_v62 }
 0x11c   : > { %1505 = vmatprep.subr.bf16.mxu0 %v1535_v22 }
 0x11d   : > { %1495 = vmatpush3.bf16.msra.mxu1 %v1494_v1 }
 0x11e   : > { %1496 = vmatprep.subr.bf16.mxu1 %v1535_v22 }
 0x11f   : > { %1507 = vmatpush3.bf16.msra.mxu0 %v1494_v1 }
 0x120   : > { %1508 = vmatprep.subr.bf16.mxu0 %v1535_v22 }
 0x121   : > { %1498 = vmatpush3.bf16.msra.mxu1 %v1497_v4 }
 0x123   : > { %1510 = vmatpush3.bf16.msra.mxu0 %v1497_v4 }
 0x1e7   : > { %v633_v7 = vpop.f32.mrb[4].mxu1 }
 0x1e8   : > { %v1345_v5 = vpop.f32.mrb[5].mxu1  ;;  %1374 = vmatmul.mubr.msk.f32.vlgmr.msra.gmra.mrb[6].mxu1 %vm719_vm2, %v633_v7 }
 0x1e9   : > { %v707_v6 = vpop.f32.mrb[8].mxu0  ;;  %1397 = vmatprep.mubr.msk.f32.mxu1 %vm875_vm3, %v871_v9 }
 0x1ea   : > { %v1356_v8 = vpop.f32.mrb[9].mxu0  ;;  %1393 = vmatmul.mubr.msk.f32.vlgmr.msra.gmra.mrb[10].mxu0 %vm719_vm2, %v707_v6 }
 0x1eb   : > { %1405 = vmatprep.mubr.msk.f32.mxu0 %vm875_vm3, %v871_v9 }
 0x2bb   : > { %v789_v10 = vpop.f32.mrb[6].mxu1 }
 0x2bc   : > { %v1375_v12 = vpop.f32.mrb[7].mxu1  ;;  %1395 = vmatprep.subr.msk.mxu1 %vm888_vm4, %v789_v10  ;;  %v866_v13 = vmul.f32 %v789_v10, %v789_v10 }
 0x2bd   : > { %v862_v15 = vpop.f32.mrb[10].mxu0  ;;  %1396 = vmatpush3.msk.msra.mxu1 %vm888_vm4, %v789_v10 }
 0x2be   : > { %v867_v16 = vsub.f32 %v862_v15, %v866_v13  ;;  %v1394_v17 = vpop.f32.mrb[11].mxu0  ;;  %1398 = vmatmul.mubr.msk.f32.vlgmr.msra.gmra.mrb[8].mxu1 %vm875_vm3, %v872_v11 }
 0x2bf   : > { %1400 = vmatprep.mubr.msk.f32.mxu1 %vm875_vm3, %v873_v14 }
 0x2c0   : > { %v868_v19 = vmax.f32 %v867_v16, 0.0 }
 0x2c2   : > { %v869_v20 = vadd.f32 1e-05, %v868_v19  ;;  %1401 = vmatmul.mubr.msk.f32.gmra.mrb[10].mxu1 %vm875_vm3, %v874_v18 }
 0x2c3   : > { %1408 = vmatprep.mubr.msk.f32.mxu1 %vm875_vm3, %v873_v14 }
 0x2c4   : > { %1524 = vrsqrt.f32 %v869_v20 }
 0x2ce   : > { %v1525_v21 = vpop.eup %1524 }
 0x2cf   : > { %1403 = vmatprep.subr.msk.mxu0 %vm888_vm4, %v1525_v21  ;;  %1511 = vmatprep.subr.msk.mxu1 %vm888_vm4, %v1525_v21 }
 0x2d0   : > { %1404 = vmatpush3.msk.msra.mxu0 %vm888_vm4, %v1525_v21  ;;  %1512 = vmatpush3.msk.msra.mxu1 %vm888_vm4, %v1525_v21 }
 0x2d1   : > { %1406 = vmatmul.mubr.msk.f32.vlgmr.msra.gmra.mrb[12].mxu0 %vm875_vm3, %v872_v11  ;;  %1409 = vmatmul.mubr.msk.f32.vlgmr.msra.gmra.mrb[12].mxu1 %vm875_vm3, %v874_v18 }
 0x391   : > { %v1399_v22 = vpop.f32.mrb[8].mxu1 }
 0x392   : > { %v958_v23 = vpop.f32.mrb[9].mxu1  ;;  %v1066_v26 = vsub.f32 %v1767_v39, %v1399_v22 }
 0x393   : > { %v1065_v28 = vsub.f32 %v1765_v33, %v958_v23 }
 0x395   : > { %v1402_v24 = vpop.f32.mrb[10].mxu1 }
 0x396   : > { %v968_v25 = vpop.f32.mrb[11].mxu1  ;;  %v1068_v27 = vsub.f32 %v1779_v51, %v1402_v24 }
 0x397   : > { %v1067_v29 = vsub.f32 %v1775_v49, %v968_v25 }
 0x3a4   : > { %v1407_v30 = vpop.f32.mrb[12].mxu0  ;;  %v1410_v32 = vpop.f32.mrb[12].mxu1 }
 0x3a5   : > { %v1070_v34 = vmul.f32 %v1407_v30, %v1066_v26  ;;  %v1072_v35 = vmul.f32 %v1410_v32, %v1068_v27  ;;  %v1046_v36 = vpop.f32.mrb[13].mxu0  ;;  %v1056_v37 = vpop.f32.mrb[13].mxu1 }
 0x3a6   : > { %v1069_v39 = vmul.f32 %v1065_v28, %v1046_v36  ;;  %v1071_v40 = vmul.f32 %v1067_v29, %v1056_v37 }
 0x3a7   : > { %v1081_v33 = vmul.f32 %v1191_v31, %v1070_v34  ;;  %v1083_v41 = vmul.f32 %v1191_v31, %v1072_v35 }
 0x3a8   : > { %v1080_v42 = vmul.f32 %v1191_v31, %v1069_v39  ;;  %v1082_v43 = vmul.f32 %v1191_v31, %v1071_v40 }
 0x3a9   : > { %v1092_v44 = vadd.f32 %v1192_v38, %v1081_v33  ;;  %v1094_v45 = vadd.f32 %v1192_v38, %v1083_v41 }
 0x3aa   : > { %v1091_v46 = vadd.f32 %v1192_v38, %v1080_v42  ;;  %v1093_v47 = vadd.f32 %v1192_v38, %v1082_v43 }
 0x3ab   : > { %v1100_v48 = vmul.f32 0.1, %v1092_v44  ;;  %vm1096_vm5 = vcmp.ge.f32.partialorder %v1092_v44, 0.0  ;;  %v1102_v51 = vmul.f32 0.1, %v1094_v45  ;;  %vm1098_vm8 = vcmp.ge.f32.partialorder %v1094_v45, 0.0 }
 0x3ac   : > { %vm1095_vm6 = vcmp.ge.f32.partialorder %v1091_v46, 0.0  ;;  %v1099_v49 = vmul.f32 0.1, %v1091_v46  ;;  %v1101_v50 = vmul.f32 0.1, %v1093_v47  ;;  %vm1097_vm7 = vcmp.ge.f32.partialorder %v1093_v47, 0.0 }
 0x3ad   : > { %v1104_v53 = vsel %vm1096_vm5, %v1092_v44, %v1100_v48  ;;  %v1106_v55 = vsel %vm1098_vm8, %v1094_v45, %v1102_v51 }
 0x3ae   : > { %v1103_v52 = vsel %vm1095_vm6, %v1091_v46, %v1099_v49  ;;  %1108 = vst.msk [vmem:[%s307_s26 + $0x8] sm:$0xff] %vm719_vm2, %v1104_v53  ;;  %v1105_v54 = vsel %vm1097_vm7, %v1093_v47, %v1101_v50  ;;  %1110 = vst.msk [vmem:[%s307_s26 + $0x18] sm:$0xff] %vm719_vm2, %v1106_v55 }
 0x3af   : > { %1107 = vst.msk [vmem:[%s307_s26] sm:$0xff] %vm719_vm2, %v1103_v52  ;;  %1109 = vst.msk [vmem:[%s307_s26 + $0x10] sm:$0xff] %vm719_vm2, %v1105_v54 }
 0x3b0 PF: > { %s18_s27 = sadd.s32 1, %s1532_s27  }
 0x3b1   : > { %p15_p4 = scmp.ge.s32.totalorder %s18_s27, 4  }
 0x3b3   :  { %17 = sbr.rel (!%p15_p4) target bundleno = 1 (0x1), region = 82 }

// kernel: decoder_forward.6
= control target key start
LH: loop header
LB: loop body
LE: loop exit
PB: predicated region body
PF: predicated region fallthrough
CT: control target
= control target key end

     0   :  { %s843_s15 = smov 0   ;;  %s1037_s0 = inlined_call_operand.vmem [shape: f32[64,64], index: 0, kind: input, shape index: {}]   ;;  %s1038_s1 = inlined_call_operand.vmem [shape: f32[64,32], index: 1, kind: input, shape index: {}]   ;;  %s1039_s2 = inlined_call_operand.vmem [shape: f32[192,128], index: 2, kind: input, shape index: {}]   ;;  %s1040_s3 = inlined_call_operand.vmem [shape: f32[1,128], index: 3, kind: input, shape index: {}]   ;;  %s1041_s4 = inlined_call_operand.vmem [shape: f32[128,128], index: 4, kind: output, shape index: {}]  }
   0x1 LB: > { %s653_s16 = sadd.s32 4294967295, %s813_s15   ;;  %p657_p0 = scmp.ge.s32.totalorder %s813_s15, 1  ;;  %s813_s15 = sphi %s843_s15, %s14_s15  }
   0x2   : > { %p163_p1 = scmp.lt.s32.totalorder %s813_s15, 3 }
   0x4   : > { %p164_p2 = pnand %p657_p0, %p163_p1 }
   0x5   : > { %s658_s17 = sshll.u32 (!%p164_p2), %s653_s16, 2  ;;  %v201_v0 = vld [vmem:[%s1038_s1] sm:$0xff] (!%p164_p2)  ;;  %vm213_vm0 = vcmask (!%p164_p2), 261120   ;;  %v202_v7 = vld [vmem:[%s1038_s1 + $0x8] sm:$0xff] (!%p164_p2)  ;;  %v203_v8 = vld [vmem:[%s1038_s1 + $0x10] sm:$0xff] (!%p164_p2)  ;;  %vm343_vm1 = vcmask (!%p164_p2), 523264  }
   0x6   : > { %167 = sbr.rel (%p164_p2) target bundleno = 599 (0x257), region = 36  ;;  %p190_p3 = scmp.lt.s32.totalorder (!%p164_p2), %s658_s17, 7  ;;  %701 = vmatprep.mubr.msk.f32.mxu0 (!%p164_p2), %vm213_vm0, %v201_v0  ;;  %v204_v9 = vld [vmem:[%s1038_s1 + $0x18] sm:$0xff] (!%p164_p2)  ;;  %v205_v10 = vld [vmem:[%s1038_s1 + $0x20] sm:$0xff] (!%p164_p2)  ;;  %v206_v11 = vld [vmem:[%s1038_s1 + $0x28] sm:$0xff] (!%p164_p2)  ;;  %vm346_vm2 = vcmask (!%p164_p2), 517120  }
   0x7   : > { %v207_v12 = vld [vmem:[%s1038_s1 + $0x30] sm:$0xff] (!%p164_p2)  ;;  %v208_v13 = vld [vmem:[%s1038_s1 + $0x38] sm:$0xff] (!%p164_p2)  ;;  %v815_v14 = vmov (!%p164_p2), 0.0   ;;  %v429_v15 = vld [vmem:[%s1039_s2] sm:$0xff] (!%p164_p2)  ;;  %v816_v18 = vmov (!%p164_p2), 0.0|0.0   ;;  %s817_s12 = smov (!%p164_p2), 64  }
   0x8   : > { %345 = vst.msk [vmem:[#allocation2 + $0x8] sm:$0xff] (!%p164_p2), %vm343_vm1, %v815_v14  ;;  %344 = vst.msk [vmem:[#allocation2] sm:$0xff] (!%p164_p2), %vm343_vm1, %v815_v14  ;;  %v430_v16 = vld [vmem:[%s1039_s2 + $0x8] sm:$0xff] (!%p164_p2)  ;;  %v431_v17 = vld [vmem:[%s1039_s2 + $0x10] sm:$0xff] (!%p164_p2)  ;;  %757 = vmatprep.subr.bf16.mxu1 (!%p164_p2), %v816_v18  ;;  %s660_s13 = sshll.u32 (!%p164_p2), %s653_s16, 3 }
   0x9   : > { %347 = vst.msk [vmem:[#allocation2 + $0x10] sm:$0x3] (!%p164_p2), %vm346_vm2, %v815_v14  ;;  %350 = vst.msk [vmem:[#allocation2 + $0x28] sm:$0x3] (!%p164_p2), %vm346_vm2, %v815_v14  ;;  %v722_v19 = vpack.c.bf16 (!%p164_p2), %v430_v16, %v429_v15  ;;  %v432_v20 = vld [vmem:[%s1039_s2 + $0x18] sm:$0xff] (!%p164_p2)  ;;  %v433_v22 = vld [vmem:[%s1039_s2 + $0x20] sm:$0xff] (!%p164_p2) }
   0xa   : > { %348 = vst.msk [vmem:[#allocation2 + $0x18] sm:$0xff] (!%p164_p2), %vm343_vm1, %v815_v14  ;;  %349 = vst.msk [vmem:[#allocation2 + $0x20] sm:$0xff] (!%p164_p2), %vm343_vm1, %v815_v14  ;;  %v725_v21 = vpack.c.bf16 (!%p164_p2), %v432_v20, %v431_v17  ;;  %v434_v23 = vld [vmem:[%s1039_s2 + $0x28] sm:$0xff] (!%p164_p2)  ;;  %v435_v25 = vld [vmem:[%s1039_s2 + $0x30] sm:$0xff] (!%p164_p2)  ;;  %p196_p4 = scmp.lt.s32.totalorder (!%p164_p2), %s660_s13, 15 }
   0xb   : > { %351 = vst.msk [vmem:[#allocation2 + $0x30] sm:$0xff] (!%p164_p2), %vm343_vm1, %v815_v14  ;;  %352 = vst.msk [vmem:[#allocation2 + $0x38] sm:$0xff] (!%p164_p2), %vm343_vm1, %v815_v14  ;;  %769 = vmatpush1.bf16.msra.mxu1 (!%p164_p2), %v722_v19  ;;  %v728_v24 = vpack.c.bf16 (!%p164_p2), %v434_v23, %v433_v22  ;;  %v436_v26 = vld [vmem:[%s1039_s2 + $0x38] sm:$0xff] (!%p164_p2)  ;;  %v437_v28 = vld [vmem:[%s1039_s2 + $0x40] sm:$0xff] (!%p164_p2) }
   0xc   : > { %353 = vst.msk [vmem:[#allocation2 + $0x40] sm:$0x3] (!%p164_p2), %vm346_vm2, %v815_v14  ;;  %356 = vst.msk [vmem:[#allocation2 + $0x58] sm:$0x3] (!%p164_p2), %vm346_vm2, %v815_v14  ;;  %758 = vmatprep.subr.bf16.mxu1 (!%p164_p2), %v816_v18  ;;  %v731_v27 = vpack.c.bf16 (!%p164_p2), %v436_v26, %v435_v25  ;;  %v438_v29 = vld [vmem:[%s1039_s2 + $0x48] sm:$0xff] (!%p164_p2)  ;;  %v439_v31 = vld [vmem:[%s1039_s2 + $0x50] sm:$0xff] (!%p164_p2) }
   0xd   : > { %s1043_s17 = smov (!%p190_p3, %s658_s17), 7  ;;  %354 = vst.msk [vmem:[#allocation2 + $0x48] sm:$0xff] %vm343_vm1, %v815_v14  ;;  %355 = vst.msk [vmem:[#allocation2 + $0x50] sm:$0xff] %vm343_vm1, %v815_v14  ;;  %v734_v30 = vpack.c.bf16 %v438_v29, %v437_v28  ;;  %v440_v32 = vld [vmem:[%s1039_s2 + $0x58] sm:$0xff]  ;;  %v441_v34 = vld [vmem:[%s1039_s2 + $0x60] sm:$0xff]  ;;  %s1045_s13 = smov (!%p196_p4, %s660_s13), 15 }
   0xe   : > { %s659_s20 = sshll.u32 %s1043_s17, 3  ;;  %v737_v33 = vpack.c.bf16 %v440_v32, %v439_v31  ;;  %v442_v35 = vld [vmem:[%s1039_s2 + $0x68] sm:$0xff]  ;;  %v443_v37 = vld [vmem:[%s1039_s2 + $0x70] sm:$0xff]  ;;  %v444_v38 = vld [vmem:[%s1039_s2 + $0x78] sm:$0xff]  ;;  %s661_s14 = sshll.u32 %s1045_s13, 3 }
   0xf   : > { %s193_s23 = scalar_lea.vmem %s1037_s0, %s659_s20  ;;  %770 = vmatpush1.bf16.msra.mxu1 %v725_v21  ;;  %v740_v36 = vpack.c.bf16 %v442_v35, %v441_v34  ;;  %v743_v39 = vpack.c.bf16 %v444_v38, %v443_v37  ;;  %v445_v40 = vld [vmem:[%s1039_s2 + $0x80] sm:$0xff]  ;;  %v446_v41 = vld [vmem:[%s1039_s2 + $0x88] sm:$0xff]  ;;  %v447_v43 = vld [vmem:[%s1039_s2 + $0x90] sm:$0xff]  ;;  %s1024_s21 = scalar_lea.vmem %s1041_s4, %s661_s14 }
  0x10   : > { %v209_v1 = vld [vmem:[%s193_s23] sm:$0xff]  ;;  %v210_v2 = vld [vmem:[%s193_s23 + $0x8] sm:$0xff]  ;;  %v211_v3 = vld [vmem:[%s193_s23 + $0x10] sm:$0xff]  ;;  %759 = vmatprep.subr.bf16.mxu1 %v816_v18  ;;  %v746_v42 = vpack.c.bf16 %v446_v41, %v445_v40 }
  0x11   : > { %v713_v4 = vpack.c.bf16 %v210_v2, %v209_v1  ;;  %v212_v5 = vld [vmem:[%s193_s23 + $0x18] sm:$0xff]  ;;  %v449_v46 = vld [vmem:[%s1039_s2 + $0xa0] sm:$0xff]  ;;  %v450_v47 = vld [vmem:[%s1039_s2 + $0xa8] sm:$0xff] }
  0x12   : > { %v717_v6 = vpack.c.bf16 %v212_v5, %v211_v3  ;;  %v448_v44 = vld [vmem:[%s1039_s2 + $0x98] sm:$0xff]  ;;  %v752_v48 = vpack.c.bf16 %v450_v47, %v449_v46  ;;  %v451_v49 = vld [vmem:[%s1039_s2 + $0xb0] sm:$0xff] }
  0x13   : > { %714 = vmatprep.subr.bf16.mxu0 %v713_v4  ;;  %771 = vmatpush1.bf16.msra.mxu1 %v728_v24  ;;  %v749_v45 = vpack.c.bf16 %v448_v44, %v447_v43  ;;  %v452_v50 = vld [vmem:[%s1039_s2 + $0xb8] sm:$0xff] }
  0x14   : > { %716 = vmatpush3.bf16.msra.mxu0 %v713_v4  ;;  %760 = vmatprep.subr.bf16.mxu1 %v816_v18  ;;  %v755_v51 = vpack.c.bf16 %v452_v50, %v451_v49 }
  0x15   : > { %718 = vmatprep.subr.bf16.mxu0 %v717_v6 }
  0x17   : > { %772 = vmatpush1.bf16.msra.mxu1 %v731_v27 }
  0x18   : > { %720 = vmatpush3.bf16.msra.mxu0 %v717_v6  ;;  %761 = vmatprep.subr.bf16.mxu1 %v816_v18 }
  0x19   : > { %721 = vmatprep.subr.bf16.mxu0 %v816_v18 }
  0x1b   : > { %702 = vmatmul.mubr.msk.f32.vlgmr.msra.gmra.mrb[0].mxu0 %vm213_vm0, %v202_v7  ;;  %773 = vmatpush1.bf16.msra.mxu1 %v734_v30 }
  0x1c   : > { %704 = vmatprep.mubr.msk.f32.mxu0 %vm213_vm0, %v203_v8  ;;  %723 = vmatpush1.bf16.msra.mxu0 %v722_v19 }
  0x1d   : > { %724 = vmatprep.subr.bf16.mxu0 %v816_v18  ;;  %762 = vmatprep.subr.bf16.mxu1 %v816_v18 }
  0x1f   : > { %705 = vmatmul.mubr.msk.f32.gmra.mrb[2].mxu0 %vm213_vm0, %v204_v9  ;;  %774 = vmatpush1.bf16.msra.mxu1 %v737_v33 }
  0x20   : > { %707 = vmatprep.mubr.msk.f32.mxu0 %vm213_vm0, %v205_v10  ;;  %726 = vmatpush1.bf16.msra.mxu0 %v725_v21 }
  0x21   : > { %727 = vmatprep.subr.bf16.mxu0 %v816_v18  ;;  %763 = vmatprep.subr.bf16.mxu1 %v816_v18 }
  0x23   : > { %708 = vmatmul.mubr.msk.f32.gmra.mrb[4].mxu0 %vm213_vm0, %v206_v11  ;;  %775 = vmatpush1.bf16.msra.mxu1 %v740_v36 }
  0x24   : > { %710 = vmatprep.mubr.msk.f32.mxu0 %vm213_vm0, %v207_v12  ;;  %729 = vmatpush1.bf16.msra.mxu0 %v728_v24 }
  0x25   : > { %730 = vmatprep.subr.bf16.mxu0 %v816_v18  ;;  %764 = vmatprep.subr.bf16.mxu1 %v816_v18 }
  0x27   : > { %711 = vmatmul.mubr.msk.f32.gmra.mrb[6].mxu0 %vm213_vm0, %v208_v13  ;;  %776 = vmatpush1.bf16.msra.mxu1 %v743_v39 }
  0x28   : > { %732 = vmatpush1.bf16.msra.mxu0 %v731_v27  ;;  %765 = vmatprep.subr.bf16.mxu1 %v816_v18 }
  0x29   : > { %733 = vmatprep.subr.bf16.mxu0 %v816_v18 }
  0x2b   : > { %777 = vmatpush1.bf16.msra.mxu1 %v746_v42 }
  0x2c   : > { %735 = vmatpush1.bf16.msra.mxu0 %v734_v30  ;;  %766 = vmatprep.subr.bf16.mxu1 %v816_v18 }
  0x2d   : > { %736 = vmatprep.subr.bf16.mxu0 %v816_v18 }
  0x2f   : > { %778 = vmatpush1.bf16.msra.mxu1 %v749_v45 }
  0x30   : > { %738 = vmatpush1.bf16.msra.mxu0 %v737_v33  ;;  %767 = vmatprep.subr.bf16.mxu1 %v816_v18 }
  0x31   : > { %739 = vmatprep.subr.bf16.mxu0 %v816_v18 }
  0x33   : > { %779 = vmatpush1.bf16.msra.mxu1 %v752_v48 }
  0x34   : > { %741 = vmatpush1.bf16.msra.mxu0 %v740_v36  ;;  %768 = vmatprep.subr.bf16.mxu1 %v816_v18 }
  0x35   : > { %742 = vmatprep.subr.bf16.mxu0 %v816_v18 }
  0x37   : > { %780 = vmatpush1.bf16.msra.mxu1 %v755_v51 }
  0x38   : > { %744 = vmatpush1.bf16.msra.mxu0 %v743_v39 }
  0x39   : > { %745 = vmatprep.subr.bf16.mxu0 %v816_v18 }
  0x3c   : > { %747 = vmatpush1.bf16.msra.mxu0 %v746_v42  ;;  %v670_v42 = vld [vmem:[%s1040_s3] ss:$0 sm:$0xff] }
  0x3d   : > { %748 = vmatprep.subr.bf16.mxu0 %v816_v18 }
  0x40   : > { %750 = vmatpush1.bf16.msra.mxu0 %v749_v45 }
  0x41   : > { %751 = vmatprep.subr.bf16.mxu0 %v816_v18 }
  0x44   : > { %753 = vmatpush1.bf16.msra.mxu0 %v752_v48 }
  0x45   : > { %754 = vmatprep.subr.bf16.mxu0 %v816_v18 }
  0x48   : > { %756 = vmatpush1.bf16.msra.mxu0 %v755_v51 }
  0xee   : > { %v703_v52 = vpop.f32.mrb[0].mxu0 }
  0xef   : > { %358 = vst.msk [vmem:[#allocation2 + $0x9] sm:$0xff] %vm343_vm1, %v703_v52  ;;  %v304_v53 = vpop.f32.mrb[1].mxu0 }
  0xf0   : > { %357 = vst.msk [vmem:[#allocation2 + $0x1] sm:$0xff] %vm343_vm1, %v304_v53 }
  0xf2   : > { %v706_v54 = vpop.f32.mrb[2].mxu0 }
  0xf3   : > { %360 = vst.msk [vmem:[#allocation2 + $0x21] sm:$0xff] %vm343_vm1, %v706_v54  ;;  %v314_v55 = vpop.f32.mrb[3].mxu0 }
  0xf4   : > { %359 = vst.msk [vmem:[#allocation2 + $0x19] sm:$0xff] %vm343_vm1, %v314_v55 }
  0xf6   : > { %v709_v56 = vpop.f32.mrb[4].mxu0  ;;  %v374_v6 = vld [vmem:[#allocation2 + $0x9] sm:$0xff] }
  0xf7   : > { %362 = vst.msk [vmem:[#allocation2 + $0x39] sm:$0xff] %vm343_vm1, %v709_v56  ;;  %v324_v57 = vpop.f32.mrb[5].mxu0  ;;  %v381_v58 = vld [vmem:[#allocation2 + $0x2] sm:$0xff]  ;;  %v382_v24 = vld [vmem:[#allocation2 + $0xa] sm:$0xff] }
  0xf8   : > { %361 = vst.msk [vmem:[#allocation2 + $0x31] sm:$0xff] %vm343_vm1, %v324_v57  ;;  %671 = vmatprep.mubr.msk.f32.mxu0 %vm343_vm1, %v381_v58  ;;  %v373_v63 = vld [vmem:[#allocation2 + $0x1] sm:$0xff] }
  0xf9   : > { %v365_v20 = vld [vmem:[#allocation2] sm:$0xff]  ;;  %v366_v30 = vld [vmem:[#allocation2 + $0x8] sm:$0xff] }
  0xfa   : > { %v712_v59 = vpop.f32.mrb[6].mxu0  ;;  %v384_v60 = vld [vmem:[#allocation2 + $0x22] sm:$0xff] }
  0xfb   : > { %v376_v61 = vld [vmem:[#allocation2 + $0x21] sm:$0xff]  ;;  %364 = vst.msk [vmem:[#allocation2 + $0x51] sm:$0xff] %vm343_vm1, %v712_v59  ;;  %674 = vmatprep.mubr.msk.f32.mxu1 %vm343_vm1, %v384_v60  ;;  %v334_v62 = vpop.f32.mrb[7].mxu0  ;;  %v375_v3 = vld [vmem:[#allocation2 + $0x19] sm:$0xff] }
  0xfc   : > { %403 = vrot.lane.b32.xlu0 %v376_v61, %s817_s12  ;;  %363 = vst.msk [vmem:[#allocation2 + $0x49] sm:$0xff] %vm343_vm1, %v334_v62  ;;  %v368_v10 = vld [vmem:[#allocation2 + $0x20] sm:$0xff]  ;;  %v367_v38 = vld [vmem:[#allocation2 + $0x18] sm:$0xff] }
  0xfd   : > { %v383_v36 = vld [vmem:[#allocation2 + $0x1a] sm:$0xff] }
  0xfe   : > { %v378_v0 = vld [vmem:[#allocation2 + $0x39] sm:$0xff] }
  0xff   : > { %v377_v1 = vld [vmem:[#allocation2 + $0x31] sm:$0xff]  ;;  %v792_v2 = vpack.i.bf16 %v378_v0, %v373_v63  ;;  %v386_v19 = vld [vmem:[#allocation2 + $0x3a] sm:$0xff] }
 0x100   : > { %405 = vrot.lane.b32.xlu0 %v377_v1, %s817_s12  ;;  %v385_v12 = vld [vmem:[#allocation2 + $0x32] sm:$0xff] }
 0x101   : > { %793 = vrot.lane.b32.xlu1 %v792_v2, %s817_s12  ;;  %v369_v14 = vld [vmem:[#allocation2 + $0x30] sm:$0xff]  ;;  %v370_v21 = vld [vmem:[#allocation2 + $0x38] sm:$0xff] }
 0x102   : > { %v380_v4 = vld [vmem:[#allocation2 + $0x51] sm:$0xff] }
 0x103   : > { %v802_v5 = vpack.i.bf16 %v380_v4, %v375_v3  ;;  %v379_v7 = vld [vmem:[#allocation2 + $0x49] sm:$0xff]  ;;  %v388_v37 = vld [vmem:[#allocation2 + $0x52] sm:$0xff] }
 0x104   : > { %v797_v8 = vpack.i.bf16 %v379_v7, %v374_v6  ;;  %v387_v27 = vld [vmem:[#allocation2 + $0x4a] sm:$0xff] }
 0x105   : > { %803 = vrot.lane.b32.xlu0 %v802_v5, %s817_s12  ;;  %v371_v31 = vld [vmem:[#allocation2 + $0x48] sm:$0xff]  ;;  %v372_v39 = vld [vmem:[#allocation2 + $0x50] sm:$0xff] }
 0x106   : > { %798 = vrot.lane.b32.xlu1 %v797_v8, %s817_s12 }
 0x16e   : > { %v404_v9 = vpop.permute.xlu0 %403 }
 0x16f   : > { %v424_v11 = vsel %vm343_vm1, %v368_v10, %v404_v9 }
 0x170   : > { %564 = vmatmul.mubr.f32.vlgmr.msra.gmra.mrb[0].mxu1 %v424_v11 }
 0x171   : > { %675 = vmatprep.mubr.msk.f32.mxu1 %vm343_vm1, %v385_v12 }
 0x172   : > { %v406_v13 = vpop.permute.xlu0 %405 }
 0x173   : > { %v794_v15 = vpop.permute.xlu1 %793  ;;  %v425_v16 = vsel %vm343_vm1, %v369_v14, %v406_v13 }
 0x174   : > { %v796_v17 = vunpack.i.h.bf16 %v794_v15  ;;  %v795_v18 = vunpack.i.l.bf16 %v794_v15  ;;  %569 = vmatmul.mubr.f32.gmra.mrb[2].mxu1 %v425_v16 }
 0x175   : > { %676 = vmatprep.mubr.msk.f32.mxu1 %vm343_vm1, %v386_v19 }
 0x176   : > { %v421_v22 = vsel %vm343_vm1, %v365_v20, %v795_v18  ;;  %v426_v23 = vsel %vm343_vm1, %v370_v21, %v796_v17 }
 0x177   : > { %549 = vmatmul.mubr.f32.vlgmr.msra.gmra.mrb[8].mxu0 %v421_v22  ;;  %v804_v25 = vpop.permute.xlu0 %803 }
 0x178   : > { %672 = vmatprep.mubr.msk.f32.mxu0 %vm343_vm1, %v382_v24  ;;  %574 = vmatmul.mubr.f32.gmra.mrb[4].mxu1 %v426_v23  ;;  %v799_v26 = vpop.permute.xlu1 %798  ;;  %v806_v32 = vunpack.i.h.bf16 %v804_v25  ;;  %v805_v33 = vunpack.i.l.bf16 %v804_v25 }
 0x179   : > { %v801_v28 = vunpack.i.h.bf16 %v799_v26  ;;  %v800_v29 = vunpack.i.l.bf16 %v799_v26  ;;  %677 = vmatprep.mubr.msk.f32.mxu1 %vm343_vm1, %v387_v27 }
 0x17a   : > { %v423_v40 = vsel %vm343_vm1, %v367_v38, %v805_v33  ;;  %v428_v41 = vsel %vm343_vm1, %v372_v39, %v806_v32 }
 0x17b   : > { %v422_v34 = vsel %vm343_vm1, %v366_v30, %v800_v29  ;;  %v427_v35 = vsel %vm343_vm1, %v371_v31, %v801_v28 }
 0x17c   : > { %554 = vmatmul.mubr.f32.gmra.mrb[10].mxu0 %v422_v34  ;;  %579 = vmatmul.mubr.f32.gmra.mrb[6].mxu1 %v427_v35 }
 0x17d   : > { %673 = vmatprep.mubr.msk.f32.mxu0 %vm343_vm1, %v383_v36  ;;  %678 = vmatprep.mubr.msk.f32.mxu1 %vm343_vm1, %v388_v37 }
 0x180   : > { %559 = vmatmul.mubr.f32.gmra.mrb[12].mxu0 %v423_v40  ;;  %584 = vmatmul.mubr.f32.gmra.mrb[8].mxu1 %v428_v41 }
 0x243   : > { %v565_v43 = vpop.f32.mrb[0].mxu1 }
 0x244   : > { %v566_v44 = vadd.f32 %v670_v42, %v565_v43  ;;  %v567_v45 = vpop.f32.mrb[1].mxu1 }
 0x246   : > { %592 = vst [vmem:[%s1024_s21 + $0x18] sm:$0xff] %v566_v44 }
 0x247   : > { %v570_v46 = vpop.f32.mrb[2].mxu1 }
 0x248   : > { %v571_v47 = vadd.f32 %v670_v42, %v570_v46  ;;  %v572_v48 = vpop.f32.mrb[3].mxu1 }
 0x24a   : > { %593 = vst [vmem:[%s1024_s21 + $0x20] sm:$0xff] %v571_v47  ;;  %v550_v49 = vpop.f32.mrb[8].mxu0 }
 0x24b   : > { %v551_v50 = vadd.f32 %v670_v42, %v550_v49  ;;  %v552_v51 = vpop.f32.mrb[9].mxu0  ;;  %v575_v52 = vpop.f32.mrb[4].mxu1 }
 0x24c   : > { %v576_v53 = vadd.f32 %v670_v42, %v575_v52  ;;  %v577_v54 = vpop.f32.mrb[5].mxu1 }
 0x24d   : > { %589 = vst [vmem:[%s1024_s21] sm:$0xff] %v551_v50 }
 0x24e   : > { %594 = vst [vmem:[%s1024_s21 + $0x28] sm:$0xff] %v576_v53 }
 0x24f   : > { %v555_v55 = vpop.f32.mrb[10].mxu0  ;;  %v580_v56 = vpop.f32.mrb[6].mxu1 }
 0x250   : > { %v556_v57 = vadd.f32 %v670_v42, %v555_v55  ;;  %v581_v58 = vadd.f32 %v670_v42, %v580_v56  ;;  %v557_v59 = vpop.f32.mrb[11].mxu0  ;;  %v582_v60 = vpop.f32.mrb[7].mxu1 }
 0x252   : > { %590 = vst [vmem:[%s1024_s21 + $0x8] sm:$0xff] %v556_v57  ;;  %595 = vst [vmem:[%s1024_s21 + $0x30] sm:$0xff] %v581_v58 }
 0x253   : > { %v560_v61 = vpop.f32.mrb[12].mxu0  ;;  %v585_v62 = vpop.f32.mrb[8].mxu1 }
 0x254   : > { %v561_v63 = vadd.f32 %v670_v42, %v560_v61  ;;  %v586_v0 = vadd.f32 %v670_v42, %v585_v62  ;;  %v562_v1 = vpop.f32.mrb[13].mxu0  ;;  %v587_v2 = vpop.f32.mrb[9].mxu1 }
 0x256   : > { %591 = vst [vmem:[%s1024_s21 + $0x10] sm:$0xff] %v561_v63  ;;  %596 = vst [vmem:[%s1024_s21 + $0x38] sm:$0xff] %v586_v0 }
 0x257 PF: > { %s14_s15 = sadd.s32 1, %s813_s15  }
 0x258   : > { %p11_p5 = scmp.ge.s32.totalorder %s14_s15, 4  }
 0x25a   :  { %13 = sbr.rel (!%p11_p5) target bundleno = 1 (0x1), region = 66 }

// kernel: decoder_forward.7
= control target key start
LH: loop header
LB: loop body
LE: loop exit
PB: predicated region body
PF: predicated region fallthrough
CT: control target
= control target key end

     0   :  { %s1823_s27 = smov 0   ;;  %s2225_s0 = inlined_call_operand.vmem [shape: f32[128,128], index: 0, kind: input, shape index: {}]   ;;  %s2226_s1 = inlined_call_operand.vmem [shape: f32[384,64], index: 1, kind: input, shape index: {}]   ;;  %s2227_s2 = inlined_call_operand.vmem [shape: f32[1,64], index: 2, kind: input, shape index: {}]   ;;  %s2228_s3 = inlined_call_operand.vmem [shape: f32[1,64], index: 3, kind: input, shape index: {}]   ;;  %s2229_s4 = inlined_call_operand.vmem [shape: f32[1,64], index: 4, kind: input, shape index: {}]   ;;  %s2230_s5 = inlined_call_operand.vmem [shape: f32[4,64], index: 5, kind: input, shape index: {}]   ;;  %s2231_s6 = inlined_call_operand.vmem [shape: f32[64,4], index: 6, kind: input, shape index: {}]   ;;  %s2232_s7 = inlined_call_operand.vmem [shape: f32[64,64], index: 7, kind: input, shape index: {}]   ;;  %s2233_s8 = inlined_call_operand.vmem [shape: f32[128,64], index: 8, kind: output, shape index: {}]  }
   0x1 LB: > { %s1322_s28 = sadd.s32 4294967295, %s1773_s27   ;;  %p1326_p0 = scmp.ge.s32.totalorder %s1773_s27, 1  ;;  %s1773_s27 = sphi %s1823_s27, %s18_s27  }
   0x2   : > { %p263_p1 = scmp.lt.s32.totalorder %s1773_s27, 3 }
   0x4   : > { %p264_p2 = pnand %p1326_p0, %p263_p1 }
   0x5   : > { %v377_v0 = vld [vmem:[%s2226_s1 + $0x80] sm:$0xff] (!%p264_p2)  ;;  %v378_v1 = vld [vmem:[%s2226_s1 + $0x88] sm:$0xff] (!%p264_p2)  ;;  %s1840_s13 = sshll.u32 (!%p264_p2), %s1322_s28, 3  ;;  %v379_v5 = vld [vmem:[%s2226_s1 + $0x90] sm:$0xff] (!%p264_p2)  ;;  %v1775_v7 = vmov (!%p264_p2), 0.0   ;;  %vm1777_vm0 = vmmov (!%p264_p2), 0  }
   0x6   : > { %267 = sbr.rel (%p264_p2) target bundleno = 967 (0x3c7), region = 52  ;;  %v361_v2 = vld [vmem:[%s2226_s1] sm:$0xff] (!%p264_p2)  ;;  %v1640_v3 = vpack.c.bf16 (!%p264_p2), %v378_v1, %v377_v0  ;;  %v362_v4 = vld [vmem:[%s2226_s1 + $0x8] sm:$0xff] (!%p264_p2)  ;;  %v380_v6 = vld [vmem:[%s2226_s1 + $0x98] sm:$0xff] (!%p264_p2)  ;;  %p298_p3 = scmp.lt.s32.totalorder (!%p264_p2), %s1840_s13, 15  ;;  %309 = vst [vmem:[#allocation2] sm:$0xff] (!%p264_p2), %v1775_v7 }
   0x7   : > { %310 = vst [vmem:[#allocation2 + $0x8] sm:$0xff] (!%p264_p2), %v1775_v7  ;;  %311 = vst [vmem:[#allocation2 + $0x10] sm:$0x3] (!%p264_p2), %v1775_v7  ;;  %v1642_v8 = vpack.c.bf16 (!%p264_p2), %v362_v4, %v361_v2  ;;  %v1644_v9 = vpack.c.bf16 (!%p264_p2), %v380_v6, %v379_v5  ;;  %v393_v10 = vld [vmem:[%s2226_s1 + $0x100] sm:$0xff] (!%p264_p2)  ;;  %v394_v11 = vld [vmem:[%s2226_s1 + $0x108] sm:$0xff] (!%p264_p2)  ;;  %vm627_vm1 = vcmask (!%p264_p2), 523264  }
   0x8   : > { %312 = vst [vmem:[#allocation2 + $0x18] sm:$0xff] (!%p264_p2), %v1775_v7  ;;  %313 = vst [vmem:[#allocation2 + $0x20] sm:$0xff] (!%p264_p2), %v1775_v7  ;;  %v363_v12 = vld [vmem:[%s2226_s1 + $0x10] sm:$0xff] (!%p264_p2)  ;;  %1641 = vmatprep.subr.bf16.mxu0 (!%p264_p2), %v1640_v3  ;;  %v1672_v13 = vpack.c.bf16 (!%p264_p2), %v394_v11, %v393_v10  ;;  %v364_v14 = vld [vmem:[%s2226_s1 + $0x18] sm:$0xff] (!%p264_p2)  ;;  %vm946_vm2 = vcmask (!%p264_p2), 31744   ;;  %vm971_vm3 = vcmask (!%p264_p2), 1043456  }
   0x9   : > { %314 = vst [vmem:[#allocation2 + $0x28] sm:$0x3] (!%p264_p2), %v1775_v7  ;;  %315 = vst [vmem:[#allocation2 + $0x30] sm:$0xff] (!%p264_p2), %v1775_v7  ;;  %v381_v15 = vld [vmem:[%s2226_s1 + $0xa0] sm:$0xff] (!%p264_p2)  ;;  %v382_v16 = vld [vmem:[%s2226_s1 + $0xa8] sm:$0xff] (!%p264_p2)  ;;  %1643 = vmatpush3.bf16.msra.mxu0 (!%p264_p2), %v1642_v8  ;;  %v1646_v17 = vpack.c.bf16 (!%p264_p2), %v364_v14, %v363_v12 }
   0xa   : > { %316 = vst [vmem:[#allocation2 + $0x38] sm:$0xff] (!%p264_p2), %v1775_v7  ;;  %317 = vst [vmem:[#allocation2 + $0x40] sm:$0x3] (!%p264_p2), %v1775_v7  ;;  %v395_v18 = vld [vmem:[%s2226_s1 + $0x110] sm:$0xff] (!%p264_p2)  ;;  %v396_v19 = vld [vmem:[%s2226_s1 + $0x118] sm:$0xff] (!%p264_p2)  ;;  %1645 = vmatprep.subr.bf16.mxu0 (!%p264_p2), %v1644_v9  ;;  %1673 = vmatprep.subr.bf16.mxu1 (!%p264_p2), %v1672_v13  ;;  %v1648_v20 = vpack.c.bf16 (!%p264_p2), %v382_v16, %v381_v15 }
   0xb   : > { %318 = vst [vmem:[#allocation2 + $0x48] sm:$0xff] (!%p264_p2), %v1775_v7  ;;  %319 = vst [vmem:[#allocation2 + $0x50] sm:$0xff] (!%p264_p2), %v1775_v7  ;;  %v1676_v21 = vpack.c.bf16 (!%p264_p2), %v396_v19, %v395_v18  ;;  %v365_v22 = vld [vmem:[%s2226_s1 + $0x20] sm:$0xff] (!%p264_p2)  ;;  %v366_v23 = vld [vmem:[%s2226_s1 + $0x28] sm:$0xff] (!%p264_p2)  ;;  %1675 = vmatpush3.bf16.msra.mxu1 (!%p264_p2), %v1672_v13 }
   0xc   : > { %320 = vst [vmem:[#allocation2 + $0x58] sm:$0x3] (!%p264_p2), %v1775_v7  ;;  %v383_v24 = vld [vmem:[%s2226_s1 + $0xb0] sm:$0xff] (!%p264_p2)  ;;  %v384_v25 = vld [vmem:[%s2226_s1 + $0xb8] sm:$0xff] (!%p264_p2)  ;;  %v397_v26 = vld [vmem:[%s2226_s1 + $0x120] sm:$0xff] (!%p264_p2)  ;;  %v1650_v29 = vpack.c.bf16 (!%p264_p2), %v366_v23, %v365_v22 }
   0xd   : > { %s2235_s13 = smov (!%p298_p3, %s1840_s13), 15  ;;  %v398_v27 = vld [vmem:[%s2226_s1 + $0x128] sm:$0xff]  ;;  %1677 = vmatprep.subr.bf16.mxu1 %v1676_v21  ;;  %1647 = vmatpush3.bf16.msra.mxu0 %v1646_v17  ;;  %v399_v30 = vld [vmem:[%s2226_s1 + $0x130] sm:$0xff]  ;;  %v400_v31 = vld [vmem:[%s2226_s1 + $0x138] sm:$0xff]  ;;  %v1652_v32 = vpack.c.bf16 %v384_v25, %v383_v24 }
   0xe   : > { %v1680_v28 = vpack.c.bf16 %v398_v27, %v397_v26  ;;  %1649 = vmatprep.subr.bf16.mxu0 %v1648_v20  ;;  %v367_v33 = vld [vmem:[%s2226_s1 + $0x30] sm:$0xff]  ;;  %v368_v34 = vld [vmem:[%s2226_s1 + $0x38] sm:$0xff]  ;;  %s1328_s16 = sshll.u32 %s2235_s13, 3  ;;  %v385_v35 = vld [vmem:[%s2226_s1 + $0xc0] sm:$0xff]  ;;  %v1684_v37 = vpack.c.bf16 %v400_v31, %v399_v30 }
   0xf   : > { %1679 = vmatpush3.bf16.msra.mxu1 %v1676_v21  ;;  %v386_v36 = vld [vmem:[%s2226_s1 + $0xc8] sm:$0xff]  ;;  %v1654_v38 = vpack.c.bf16 %v368_v34, %v367_v33  ;;  %v401_v39 = vld [vmem:[%s2226_s1 + $0x140] sm:$0xff]  ;;  %s1941_s28 = scalar_lea.vmem %s2225_s0, %s1328_s16  ;;  %v387_v44 = vld [vmem:[%s2226_s1 + $0xd0] sm:$0xff]  ;;  %v1776_v34 = vmov 0.0|0.0   ;;  %s2204_s14 = scalar_lea.vmem %s2233_s8, %s1328_s16 }
  0x10   : > { %1681 = vmatprep.subr.bf16.mxu1 %v1680_v28  ;;  %v402_v40 = vld [vmem:[%s2226_s1 + $0x148] sm:$0xff]  ;;  %v1656_v41 = vpack.c.bf16 %v386_v36, %v385_v35  ;;  %v369_v42 = vld [vmem:[%s2226_s1 + $0x40] sm:$0xff]  ;;  %v388_v45 = vld [vmem:[%s2226_s1 + $0xd8] sm:$0xff] }
  0x11   : > { %1651 = vmatpush3.bf16.msra.mxu0 %v1650_v29  ;;  %v370_v43 = vld [vmem:[%s2226_s1 + $0x48] sm:$0xff]  ;;  %v1688_v46 = vpack.c.bf16 %v402_v40, %v401_v39  ;;  %v371_v47 = vld [vmem:[%s2226_s1 + $0x50] sm:$0xff]  ;;  %v372_v48 = vld [vmem:[%s2226_s1 + $0x58] sm:$0xff]  ;;  %v1660_v56 = vpack.c.bf16 %v388_v45, %v387_v44 }
  0x12   : > { %1653 = vmatprep.subr.bf16.mxu0 %v1652_v32  ;;  %v403_v49 = vld [vmem:[%s2226_s1 + $0x150] sm:$0xff]  ;;  %v321_v50 = vld [vmem:[%s1941_s28] sm:$0xff]  ;;  %v1658_v51 = vpack.c.bf16 %v370_v43, %v369_v42  ;;  %v404_v53 = vld [vmem:[%s2226_s1 + $0x158] sm:$0xff]  ;;  %v1662_v0 = vpack.c.bf16 %v372_v48, %v371_v47 }
  0x13   : > { %1683 = vmatpush3.bf16.msra.mxu1 %v1680_v28  ;;  %v389_v52 = vld [vmem:[%s2226_s1 + $0xe0] sm:$0xff]  ;;  %329 = vst [vmem:[#allocation2 + $0x1] sm:$0xff] %v321_v50  ;;  %480 = vmatprep.mubr.f32.mxu0 %v321_v50  ;;  %v322_v54 = vld [vmem:[%s1941_s28 + $0x8] sm:$0xff]  ;;  %v323_v55 = vld [vmem:[%s1941_s28 + $0x10] sm:$0xff]  ;;  %v1692_v63 = vpack.c.bf16 %v404_v53, %v403_v49 }
  0x14   : > { %1685 = vmatprep.subr.bf16.mxu1 %v1684_v37  ;;  %330 = vst [vmem:[#allocation2 + $0x9] sm:$0xff] %v322_v54  ;;  %331 = vst [vmem:[#allocation2 + $0x19] sm:$0xff] %v323_v55  ;;  %v1974_v57 = vld [vmem:[%s1941_s28 + $0x18] sm:$0xff]  ;;  %v1977_v58 = vld [vmem:[%s1941_s28 + $0x20] sm:$0xff] }
  0x15   : > { %1655 = vmatpush3.bf16.msra.mxu0 %v1654_v38  ;;  %v1980_v59 = vld [vmem:[%s1941_s28 + $0x28] sm:$0xff]  ;;  %332 = vst [vmem:[#allocation2 + $0x21] sm:$0xff] %v1974_v57  ;;  %333 = vst [vmem:[#allocation2 + $0x31] sm:$0xff] %v1977_v58  ;;  %v1989_v61 = vld [vmem:[%s1941_s28 + $0x30] sm:$0xff] }
  0x16   : > { %1657 = vmatprep.subr.bf16.mxu0 %v1656_v41  ;;  %v390_v60 = vld [vmem:[%s2226_s1 + $0xe8] sm:$0xff]  ;;  %334 = vst [vmem:[#allocation2 + $0x39] sm:$0xff] %v1980_v59  ;;  %v1992_v62 = vld [vmem:[%s1941_s28 + $0x38] sm:$0xff]  ;;  %335 = vst [vmem:[#allocation2 + $0x49] sm:$0xff] %v1989_v61 }
  0x17   : > { %1687 = vmatpush3.bf16.msra.mxu1 %v1684_v37  ;;  %336 = vst [vmem:[#allocation2 + $0x51] sm:$0xff] %v1992_v62  ;;  %v405_v1 = vld [vmem:[%s2226_s1 + $0x160] sm:$0xff]  ;;  %v406_v2 = vld [vmem:[%s2226_s1 + $0x168] sm:$0xff]  ;;  %v1664_v3 = vpack.c.bf16 %v390_v60, %v389_v52  ;;  %v391_v6 = vld [vmem:[%s2226_s1 + $0xf0] sm:$0xff] }
  0x18   : > { %1689 = vmatprep.subr.bf16.mxu1 %v1688_v46  ;;  %v373_v4 = vld [vmem:[%s2226_s1 + $0x60] sm:$0xff]  ;;  %v374_v5 = vld [vmem:[%s2226_s1 + $0x68] sm:$0xff]  ;;  %v392_v8 = vld [vmem:[%s2226_s1 + $0xf8] sm:$0xff]  ;;  %v1696_v9 = vpack.c.bf16 %v406_v2, %v405_v1 }
  0x19   : > { %1659 = vmatpush3.bf16.msra.mxu0 %v1658_v51  ;;  %v1666_v10 = vpack.c.bf16 %v374_v5, %v373_v4  ;;  %v407_v11 = vld [vmem:[%s2226_s1 + $0x170] sm:$0xff]  ;;  %v408_v12 = vld [vmem:[%s2226_s1 + $0x178] sm:$0xff]  ;;  %v1668_v14 = vpack.c.bf16 %v392_v8, %v391_v6  ;;  %v2040_v37 = vld [vmem:[%s2227_s2] ss:$0 sm:$0xff] }
  0x1a   : > { %1661 = vmatprep.subr.bf16.mxu0 %v1660_v56  ;;  %v375_v15 = vld [vmem:[%s2226_s1 + $0x70] sm:$0xff]  ;;  %v376_v16 = vld [vmem:[%s2226_s1 + $0x78] sm:$0xff]  ;;  %v1700_v17 = vpack.c.bf16 %v408_v12, %v407_v11  ;;  %v337_v19 = vld [vmem:[#allocation2] sm:$0xff] }
  0x1b   : > { %1691 = vmatpush3.bf16.msra.mxu1 %v1688_v46  ;;  %v353_v13 = vld [vmem:[#allocation2 + $0x2] sm:$0xff]  ;;  %v1670_v18 = vpack.c.bf16 %v376_v16, %v375_v15  ;;  %v354_v20 = vld [vmem:[#allocation2 + $0xa] sm:$0xff]  ;;  %v339_v25 = vld [vmem:[#allocation2 + $0x18] sm:$0xff] }
  0x1c   : > { %1693 = vmatprep.subr.bf16.mxu1 %v1692_v63  ;;  %1524 = vmatprep.mubr.f32.mxu1 %v353_v13  ;;  %v355_v21 = vld [vmem:[#allocation2 + $0x1a] sm:$0xff]  ;;  %v338_v22 = vld [vmem:[#allocation2 + $0x8] sm:$0xff]  ;;  %v341_v30 = vld [vmem:[#allocation2 + $0x30] sm:$0xff] }
  0x1d   : > { %1663 = vmatpush3.bf16.msra.mxu0 %v1662_v0  ;;  %v356_v23 = vld [vmem:[#allocation2 + $0x22] sm:$0xff]  ;;  %v357_v24 = vld [vmem:[#allocation2 + $0x32] sm:$0xff]  ;;  %v358_v26 = vld [vmem:[#allocation2 + $0x3a] sm:$0xff] }
  0x1e   : > { %1665 = vmatprep.subr.bf16.mxu0 %v1664_v3  ;;  %v359_v27 = vld [vmem:[#allocation2 + $0x4a] sm:$0xff]  ;;  %v340_v28 = vld [vmem:[#allocation2 + $0x20] sm:$0xff]  ;;  %v360_v29 = vld [vmem:[#allocation2 + $0x52] sm:$0xff] }
  0x1f   : > { %1695 = vmatpush3.bf16.msra.mxu1 %v1692_v63  ;;  %v342_v31 = vld [vmem:[#allocation2 + $0x38] sm:$0xff]  ;;  %v343_v32 = vld [vmem:[#allocation2 + $0x48] sm:$0xff]  ;;  %v344_v33 = vld [vmem:[#allocation2 + $0x50] sm:$0xff] }
  0x20   : > { %1697 = vmatprep.subr.bf16.mxu1 %v1696_v9 }
  0x21   : > { %1667 = vmatpush3.bf16.msra.mxu0 %v1666_v10 }
  0x22   : > { %1669 = vmatprep.subr.bf16.mxu0 %v1668_v14 }
  0x23   : > { %1699 = vmatpush3.bf16.msra.mxu1 %v1696_v9 }
  0x24   : > { %1701 = vmatprep.subr.bf16.mxu1 %v1700_v17 }
  0x25   : > { %1671 = vmatpush3.bf16.msra.mxu0 %v1670_v18 }
  0x26   : > { %1716 = vmatprep.subr.bf16.mxu0 %v1776_v34 }
  0x27   : > { %1703 = vmatpush3.bf16.msra.mxu1 %v1700_v17 }
  0x28   : > { %481 = vmatmul.mubr.f32.vlgmr.msra.gmra.mrb[0].mxu0 %v337_v19  ;;  %1704 = vmatprep.subr.bf16.mxu1 %v1776_v34 }
  0x29   : > { %485 = vmatprep.mubr.f32.mxu0 %v322_v54 }
  0x2a   : > { %1525 = vmatmul.mubr.f32.vlgmr.msra.gmra.mrb[0].mxu1 %v354_v20 }
  0x2b   : > { %1527 = vmatprep.mubr.f32.mxu1 %v355_v21 }
  0x2c   : > { %486 = vmatmul.mubr.f32.gmra.mrb[2].mxu0 %v338_v22 }
  0x2d   : > { %490 = vmatprep.mubr.f32.mxu0 %v323_v55 }
  0x2e   : > { %1528 = vmatmul.mubr.f32.gmra.mrb[2].mxu1 %v356_v23 }
  0x2f   : > { %1530 = vmatprep.mubr.f32.mxu1 %v357_v24 }
  0x30   : > { %491 = vmatmul.mubr.f32.gmra.mrb[4].mxu0 %v339_v25 }
  0x31   : > { %495 = vmatprep.mubr.f32.mxu0 %v1974_v57 }
  0x32   : > { %1531 = vmatmul.mubr.f32.gmra.mrb[4].mxu1 %v358_v26 }
  0x33   : > { %1533 = vmatprep.mubr.f32.mxu1 %v359_v27 }
  0x34   : > { %496 = vmatmul.mubr.f32.gmra.mrb[6].mxu0 %v340_v28 }
  0x35   : > { %500 = vmatprep.mubr.f32.mxu0 %v1977_v58 }
  0x36   : > { %1534 = vmatmul.mubr.f32.gmra.mrb[6].mxu1 %v360_v29 }
  0x37   : > { %1552 = vmatprep.mubr.msk.f32.mxu1 %vm1777_vm0, %v1775_v7 }
  0x38   : > { %501 = vmatmul.mubr.f32.gmra.mrb[8].mxu0 %v341_v30 }
  0x39   : > { %505 = vmatprep.mubr.f32.mxu0 %v1980_v59 }
  0x3c   : > { %506 = vmatmul.mubr.f32.gmra.mrb[10].mxu0 %v342_v31 }
  0x3d   : > { %510 = vmatprep.mubr.f32.mxu0 %v1989_v61 }
  0x40   : > { %511 = vmatmul.mubr.f32.gmra.mrb[12].mxu0 %v343_v32 }
  0x41   : > { %515 = vmatprep.mubr.f32.mxu0 %v1992_v62 }
  0x44   : > { %516 = vmatmul.mubr.f32.gmra.mrb[14].mxu0 %v344_v33  ;;  %v779_v33 = vld [vmem:[%s2232_s7] sm:$0xff] }
  0x45   : > { %1571 = vmatprep.mubr.msk.f32.mxu0 %vm1777_vm0, %v1775_v7 }
  0xfb   : > { %v1390_v35 = vpop.f32.mrb[0].mxu0 }
  0xfc   : > { %v1391_v36 = vpop.f32.mrb[1].mxu0 }
  0xfd   : > { %v1392_v38 = vadd.f32 %v1391_v36, %v1390_v35  ;;  %v1526_v39 = vpop.f32.mrb[0].mxu1  ;;  %v780_v35 = vld [vmem:[%s2232_s7 + $0x8] sm:$0xff] }
  0xfe   : > { %v587_v40 = vpop.f32.mrb[1].mxu1 }
  0xff   : > { %v1393_v41 = vpop.f32.mrb[2].mxu0  ;;  %v483_v42 = vadd.f32 %v1392_v38, %v2040_v37 }
 0x100   : > { %v1394_v43 = vpop.f32.mrb[3].mxu0 }
 0x101   : > { %v1395_v44 = vadd.f32 %v1394_v43, %v1393_v41  ;;  %v2043_v45 = vadd.f32 %v587_v40, %v483_v42  ;;  %v1529_v46 = vpop.f32.mrb[2].mxu1  ;;  %v626_v40 = vld [vmem:[%s2230_s5] sm:$0xf]  ;;  %v1729_v41 = vpack.c.bf16 %v780_v35, %v779_v33  ;;  %v781_v42 = vld [vmem:[%s2232_s7 + $0x10] sm:$0xff]  ;;  %v782_v43 = vld [vmem:[%s2232_s7 + $0x18] sm:$0xff] }
 0x102   : > { %v597_v47 = vpop.f32.mrb[3].mxu1 }
 0x103   : > { %v488_v48 = vadd.f32 %v1395_v44, %v2040_v37  ;;  %v1396_v49 = vpop.f32.mrb[4].mxu0  ;;  %v701_v56 = vmul.f32 %v2043_v45, %v2043_v45  ;;  %v1732_v44 = vpack.c.bf16 %v782_v43, %v781_v42 }
 0x104   : > { %v1397_v50 = vpop.f32.mrb[5].mxu0 }
 0x105   : > { %v2046_v51 = vadd.f32 %v1526_v39, %v488_v48  ;;  %v1398_v52 = vadd.f32 %v1397_v50, %v1396_v49  ;;  %v1532_v53 = vpop.f32.mrb[4].mxu1  ;;  %v785_v49 = vld [vmem:[%s2232_s7 + $0x30] sm:$0xff]  ;;  %v786_v50 = vld [vmem:[%s2232_s7 + $0x38] sm:$0xff] }
 0x106   : > { %v607_v54 = vpop.f32.mrb[5].mxu1 }
 0x107   : > { %v1705_v55 = vpack.c.bf16 %v2046_v51, %v2043_v45  ;;  %v702_v57 = vmul.f32 %v2046_v51, %v2046_v51  ;;  %v1399_v58 = vpop.f32.mrb[6].mxu0  ;;  %v493_v59 = vadd.f32 %v1398_v52, %v2040_v37  ;;  %v1738_v52 = vpack.c.bf16 %v786_v50, %v785_v49 }
 0x108   : > { %v1400_v60 = vpop.f32.mrb[7].mxu0 }
 0x109   : > { %v1717_v61 = vpack.c.bf16 %v702_v57, %v701_v56  ;;  %v1401_v62 = vadd.f32 %v1400_v60, %v1399_v58  ;;  %v2055_v63 = vadd.f32 %v597_v47, %v493_v59  ;;  %1706 = vmatpush3.bf16.msra.mxu1 %v1705_v55  ;;  %v1535_v0 = vpop.f32.mrb[6].mxu1  ;;  %v784_v47 = vld [vmem:[%s2232_s7 + $0x28] sm:$0xff]  ;;  %v938_v56 = vld [vmem:[%s2231_s6] sm:$0xff]  ;;  %v940_v60 = vld [vmem:[%s2231_s6 + $0x10] sm:$0xff] }
 0x10a   : > { %1707 = vmatprep.subr.bf16.mxu1 %v1776_v34  ;;  %v617_v1 = vpop.f32.mrb[7].mxu1  ;;  %v939_v57 = vld [vmem:[%s2231_s6 + $0x8] sm:$0xff] }
 0x10b   : > { %v498_v2 = vadd.f32 %v1401_v62, %v2040_v37  ;;  %v1402_v3 = vpop.f32.mrb[8].mxu0  ;;  %1718 = vmatpush3.bf16.msra.mxu0 %v1717_v61  ;;  %v703_v9 = vmul.f32 %v2055_v63, %v2055_v63 }
 0x10c   : > { %v1403_v4 = vpop.f32.mrb[9].mxu0  ;;  %1719 = vmatprep.subr.bf16.mxu0 %v1776_v34 }
 0x10d   : > { %v2060_v5 = vadd.f32 %v1529_v46, %v498_v2  ;;  %v1404_v6 = vadd.f32 %v1403_v4, %v1402_v3  ;;  %v783_v46 = vld [vmem:[%s2232_s7 + $0x20] sm:$0xff] }
 0x10e   : > { %v1735_v48 = vpack.c.bf16 %v784_v47, %v783_v46  ;;  %v942_v3 = vld [vmem:[%s2231_s6 + $0x20] sm:$0xff] }
 0x10f   : > { %v1708_v8 = vpack.c.bf16 %v2060_v5, %v2055_v63  ;;  %v704_v10 = vmul.f32 %v2060_v5, %v2060_v5  ;;  %v1405_v11 = vpop.f32.mrb[10].mxu0  ;;  %v503_v12 = vadd.f32 %v1404_v6, %v2040_v37  ;;  %v943_v6 = vld [vmem:[%s2231_s6 + $0x28] sm:$0xff] }
 0x110   : > { %v1406_v13 = vpop.f32.mrb[11].mxu0 }
 0x111   : > { %v1720_v14 = vpack.c.bf16 %v704_v10, %v703_v9  ;;  %v1407_v15 = vadd.f32 %v1406_v13, %v1405_v11  ;;  %v2069_v16 = vadd.f32 %v607_v54, %v503_v12  ;;  %1709 = vmatpush3.bf16.msra.mxu1 %v1708_v8  ;;  %v944_v8 = vld [vmem:[%s2231_s6 + $0x30] sm:$0xff]  ;;  %v945_v9 = vld [vmem:[%s2231_s6 + $0x38] sm:$0xff] }
 0x112   : > { %1710 = vmatprep.subr.bf16.mxu1 %v1776_v34 }
 0x113   : > { %v508_v17 = vadd.f32 %v1407_v15, %v2040_v37  ;;  %v1408_v18 = vpop.f32.mrb[12].mxu0  ;;  %1721 = vmatpush3.bf16.msra.mxu0 %v1720_v14  ;;  %v705_v23 = vmul.f32 %v2069_v16, %v2069_v16 }
 0x114   : > { %v1409_v19 = vpop.f32.mrb[13].mxu0  ;;  %1722 = vmatprep.subr.bf16.mxu0 %v1776_v34 }
 0x115   : > { %v2074_v20 = vadd.f32 %v1532_v53, %v508_v17  ;;  %v1410_v21 = vadd.f32 %v1409_v19, %v1408_v18 }
 0x117   : > { %v1711_v22 = vpack.c.bf16 %v2074_v20, %v2069_v16  ;;  %v706_v24 = vmul.f32 %v2074_v20, %v2074_v20  ;;  %v1411_v25 = vpop.f32.mrb[14].mxu0  ;;  %v513_v26 = vadd.f32 %v1410_v21, %v2040_v37 }
 0x118   : > { %v1412_v27 = vpop.f32.mrb[15].mxu0 }
 0x119   : > { %v1723_v28 = vpack.c.bf16 %v706_v24, %v705_v23  ;;  %v1413_v29 = vadd.f32 %v1412_v27, %v1411_v25  ;;  %v2083_v30 = vadd.f32 %v617_v1, %v513_v26  ;;  %1712 = vmatpush3.bf16.msra.mxu1 %v1711_v22  ;;  %v941_v1 = vld [vmem:[%s2231_s6 + $0x18] sm:$0xff]  ;;  %v1354_v26 = vld [vmem:[%s2228_s3] ss:$0 sm:$0xff] }
 0x11a   : > { %1713 = vmatprep.subr.bf16.mxu1 %v1776_v34 }
 0x11b   : > { %v518_v31 = vadd.f32 %v1413_v29, %v2040_v37  ;;  %1724 = vmatpush3.bf16.msra.mxu0 %v1723_v28  ;;  %v707_v38 = vmul.f32 %v2083_v30, %v2083_v30 }
 0x11c   : > { %1725 = vmatprep.subr.bf16.mxu0 %v1776_v34 }
 0x11d   : > { %v2088_v32 = vadd.f32 %v1535_v0, %v518_v31 }
 0x11f   : > { %v1714_v36 = vpack.c.bf16 %v2088_v32, %v2083_v30  ;;  %v708_v37 = vmul.f32 %v2088_v32, %v2088_v32 }
 0x121   : > { %v1726_v39 = vpack.c.bf16 %v708_v37, %v707_v38  ;;  %1715 = vmatpush3.bf16.msra.mxu1 %v1714_v36 }
 0x122   : > { %1728 = vmatprep.subr.bf16.mxu1 %v1776_v34 }
 0x123   : > { %1727 = vmatpush3.bf16.msra.mxu0 %v1726_v39 }
 0x124   : > { %1553 = vmatmul.mubr.msk.f32.vlgmr.msra.gmra.mrb[8].mxu1 %vm627_vm1, %v626_v40  ;;  %1740 = vmatprep.subr.bf16.mxu0 %v1776_v34 }
 0x125   : > { %1730 = vmatpush3.bf16.msra.mxu1 %v1729_v41  ;;  %1590 = vmatprep.mubr.msk.f32.mxu1 %vm1777_vm0, %v1775_v7 }
 0x126   : > { %1572 = vmatmul.mubr.msk.f32.vlgmr.msra.gmra.mrb[16].mxu0 %vm627_vm1, %v626_v40  ;;  %1731 = vmatprep.subr.bf16.mxu1 %v1776_v34 }
 0x127   : > { %1742 = vmatpush3.bf16.msra.mxu0 %v1729_v41  ;;  %1609 = vmatprep.mubr.msk.f32.mxu0 %vm1777_vm0, %v1775_v7 }
 0x128   : > { %1743 = vmatprep.subr.bf16.mxu0 %v1776_v34 }
 0x129   : > { %1733 = vmatpush3.bf16.msra.mxu1 %v1732_v44 }
 0x12a   : > { %1734 = vmatprep.subr.bf16.mxu1 %v1776_v34 }
 0x12b   : > { %1745 = vmatpush3.bf16.msra.mxu0 %v1732_v44 }
 0x12c   : > { %1746 = vmatprep.subr.bf16.mxu0 %v1776_v34 }
 0x12d   : > { %1736 = vmatpush3.bf16.msra.mxu1 %v1735_v48 }
 0x12e   : > { %1737 = vmatprep.subr.bf16.mxu1 %v1776_v34 }
 0x12f   : > { %1748 = vmatpush3.bf16.msra.mxu0 %v1735_v48 }
 0x130   : > { %1749 = vmatprep.subr.bf16.mxu0 %v1776_v34 }
 0x131   : > { %1739 = vmatpush3.bf16.msra.mxu1 %v1738_v52 }
 0x133   : > { %1751 = vmatpush3.bf16.msra.mxu0 %v1738_v52 }
 0x1f7   : > { %v697_v7 = vpop.f32.mrb[8].mxu1 }
 0x1f8   : > { %v1554_v53 = vpop.f32.mrb[9].mxu1  ;;  %1591 = vmatmul.mubr.msk.f32.vlgmr.msra.gmra.mrb[10].mxu1 %vm627_vm1, %v697_v7 }
 0x1f9   : > { %v775_v54 = vpop.f32.mrb[16].mxu0  ;;  %1614 = vmatprep.mubr.msk.f32.mxu1 %vm946_vm2, %v938_v56 }
 0x1fa   : > { %v1573_v55 = vpop.f32.mrb[17].mxu0  ;;  %1610 = vmatmul.mubr.msk.f32.vlgmr.msra.gmra.mrb[18].mxu0 %vm627_vm1, %v775_v54 }
 0x1fb   : > { %1628 = vmatprep.mubr.msk.f32.mxu0 %vm946_vm2, %v938_v56 }
 0x2cb   : > { %v856_v34 = vpop.f32.mrb[10].mxu1 }
 0x2cc   : > { %v1592_v58 = vpop.f32.mrb[11].mxu1  ;;  %1612 = vmatprep.subr.msk.mxu1 %vm971_vm3, %v856_v34  ;;  %v933_v59 = vmul.f32 %v856_v34, %v856_v34 }
 0x2cd   : > { %v929_v61 = vpop.f32.mrb[18].mxu0  ;;  %1613 = vmatpush3.msk.msra.mxu1 %vm971_vm3, %v856_v34 }
 0x2ce   : > { %v934_v62 = vsub.f32 %v929_v61, %v933_v59  ;;  %v1611_v0 = vpop.f32.mrb[19].mxu0  ;;  %1615 = vmatmul.mubr.msk.f32.vlgmr.msra.gmra.mrb[12].mxu1 %vm946_vm2, %v939_v57 }
 0x2cf   : > { %1617 = vmatprep.mubr.msk.f32.mxu1 %vm946_vm2, %v940_v60 }
 0x2d0   : > { %v935_v2 = vmax.f32 %v934_v62, 0.0 }
 0x2d2   : > { %v936_v4 = vadd.f32 1e-05, %v935_v2  ;;  %1618 = vmatmul.mubr.msk.f32.gmra.mrb[14].mxu1 %vm946_vm2, %v941_v1 }
 0x2d3   : > { %1620 = vmatprep.mubr.msk.f32.mxu1 %vm946_vm2, %v942_v3 }
 0x2d4   : > { %1765 = vrsqrt.f32 %v936_v4 }
 0x2d6   : > { %1621 = vmatmul.mubr.msk.f32.gmra.mrb[16].mxu1 %vm946_vm2, %v943_v6 }
 0x2d7   : > { %1623 = vmatprep.mubr.msk.f32.mxu1 %vm946_vm2, %v944_v8 }
 0x2da   : > { %1624 = vmatmul.mubr.msk.f32.gmra.mrb[18].mxu1 %vm946_vm2, %v945_v9 }
 0x2db   : > { %1634 = vmatprep.mubr.msk.f32.mxu1 %vm946_vm2, %v942_v3 }
 0x2de   : > { %v1766_v10 = vpop.eup %1765 }
 0x2df   : > { %1626 = vmatprep.subr.msk.mxu0 %vm971_vm3, %v1766_v10  ;;  %1752 = vmatprep.subr.msk.mxu1 %vm971_vm3, %v1766_v10 }
 0x2e0   : > { %1627 = vmatpush3.msk.msra.mxu0 %vm971_vm3, %v1766_v10  ;;  %1753 = vmatpush3.msk.msra.mxu1 %vm971_vm3, %v1766_v10 }
 0x2e1   : > { %1629 = vmatmul.mubr.msk.f32.vlgmr.msra.gmra.mrb[20].mxu0 %vm946_vm2, %v939_v57  ;;  %1635 = vmatmul.mubr.msk.f32.vlgmr.msra.gmra.mrb[20].mxu1 %vm946_vm2, %v943_v6 }
 0x2e2   : > { %1631 = vmatprep.mubr.msk.f32.mxu0 %vm946_vm2, %v940_v60  ;;  %1637 = vmatprep.mubr.msk.f32.mxu1 %vm946_vm2, %v944_v8 }
 0x2e5   : > { %1632 = vmatmul.mubr.msk.f32.gmra.mrb[22].mxu0 %vm946_vm2, %v941_v1  ;;  %1638 = vmatmul.mubr.msk.f32.gmra.mrb[22].mxu1 %vm946_vm2, %v945_v9 }
 0x3a1   : > { %v1616_v11 = vpop.f32.mrb[12].mxu1 }
 0x3a2   : > { %v1041_v12 = vpop.f32.mrb[13].mxu1  ;;  %v1189_v21 = vsub.f32 %v2046_v51, %v1616_v11  ;;  %v1355_v51 = vld [vmem:[%s2229_s4] ss:$0 sm:$0xff] }
 0x3a3   : > { %v1188_v23 = vsub.f32 %v2043_v45, %v1041_v12 }
 0x3a5   : > { %v1619_v13 = vpop.f32.mrb[14].mxu1 }
 0x3a6   : > { %v1051_v14 = vpop.f32.mrb[15].mxu1  ;;  %v1191_v45 = vsub.f32 %v2060_v5, %v1619_v13 }
 0x3a7   : > { %v1190_v37 = vsub.f32 %v2055_v63, %v1051_v14 }
 0x3a9   : > { %v1622_v15 = vpop.f32.mrb[16].mxu1 }
 0x3aa   : > { %v1061_v17 = vpop.f32.mrb[17].mxu1  ;;  %v1193_v22 = vsub.f32 %v2074_v20, %v1622_v15 }
 0x3ab   : > { %v1192_v24 = vsub.f32 %v2069_v16, %v1061_v17 }
 0x3ad   : > { %v1625_v18 = vpop.f32.mrb[18].mxu1 }
 0x3ae   : > { %v1071_v19 = vpop.f32.mrb[19].mxu1  ;;  %v1195_v16 = vsub.f32 %v2088_v32, %v1625_v18 }
 0x3af   : > { %v1194_v39 = vsub.f32 %v2083_v30, %v1071_v19 }
 0x3b4   : > { %v1630_v25 = vpop.f32.mrb[20].mxu0  ;;  %v1636_v27 = vpop.f32.mrb[20].mxu1 }
 0x3b5   : > { %v1197_v28 = vmul.f32 %v1630_v25, %v1189_v21  ;;  %v1201_v29 = vmul.f32 %v1636_v27, %v1193_v22  ;;  %v1149_v31 = vpop.f32.mrb[21].mxu0  ;;  %v1169_v33 = vpop.f32.mrb[21].mxu1 }
 0x3b6   : > { %v1196_v35 = vmul.f32 %v1188_v23, %v1149_v31  ;;  %v1200_v20 = vmul.f32 %v1192_v24, %v1169_v33 }
 0x3b7   : > { %v1212_v36 = vmul.f32 %v1354_v26, %v1197_v28  ;;  %v1216_v38 = vmul.f32 %v1354_v26, %v1201_v29 }
 0x3b8   : > { %v1211_v40 = vmul.f32 %v1354_v26, %v1196_v35  ;;  %v1215_v41 = vmul.f32 %v1354_v26, %v1200_v20  ;;  %v1633_v42 = vpop.f32.mrb[22].mxu0  ;;  %v1639_v43 = vpop.f32.mrb[22].mxu1 }
 0x3b9   : > { %v1227_v44 = vadd.f32 %v1355_v51, %v1212_v36  ;;  %v1231_v46 = vadd.f32 %v1355_v51, %v1216_v38  ;;  %v1199_v47 = vmul.f32 %v1633_v42, %v1191_v45  ;;  %v1203_v48 = vmul.f32 %v1639_v43, %v1195_v16  ;;  %v1159_v49 = vpop.f32.mrb[23].mxu0  ;;  %v1179_v50 = vpop.f32.mrb[23].mxu1 }
 0x3ba   : > { %v1226_v5 = vadd.f32 %v1355_v51, %v1211_v40  ;;  %v1230_v52 = vadd.f32 %v1355_v51, %v1215_v41  ;;  %v1198_v32 = vmul.f32 %v1190_v37, %v1159_v49  ;;  %v1202_v7 = vmul.f32 %v1194_v39, %v1179_v50 }
 0x3bb   : > { %vm1235_vm4 = vcmp.ge.f32.partialorder %v1227_v44, 0.0  ;;  %v1243_v63 = vmul.f32 0.1, %v1227_v44  ;;  %vm1239_vm5 = vcmp.ge.f32.partialorder %v1231_v46, 0.0  ;;  %v1247_v30 = vmul.f32 0.1, %v1231_v46 }
 0x3bc   : > { %vm1234_vm6 = vcmp.ge.f32.partialorder %v1226_v5, 0.0  ;;  %v1242_v53 = vmul.f32 0.1, %v1226_v5  ;;  %vm1238_vm7 = vcmp.ge.f32.partialorder %v1230_v52, 0.0  ;;  %v1246_v54 = vmul.f32 0.1, %v1230_v52 }
 0x3bd   : > { %v1251_v55 = vsel %vm1235_vm4, %v1227_v44, %v1243_v63  ;;  %v1255_v56 = vsel %vm1239_vm5, %v1231_v46, %v1247_v30  ;;  %v1214_v34 = vmul.f32 %v1354_v26, %v1199_v47  ;;  %v1218_v57 = vmul.f32 %v1354_v26, %v1203_v48 }
 0x3be   : > { %1259 = vst.msk [vmem:[%s2204_s14 + $0x8] sm:$0xff] %vm627_vm1, %v1251_v55  ;;  %1263 = vst.msk [vmem:[%s2204_s14 + $0x28] sm:$0xff] %vm627_vm1, %v1255_v56  ;;  %v1250_v58 = vsel %vm1234_vm6, %v1226_v5, %v1242_v53  ;;  %v1254_v59 = vsel %vm1238_vm7, %v1230_v52, %v1246_v54  ;;  %v1213_v60 = vmul.f32 %v1354_v26, %v1198_v32 }
 0x3bf   : > { %v1217_v61 = vmul.f32 %v1354_v26, %v1202_v7  ;;  %1258 = vst.msk [vmem:[%s2204_s14] sm:$0xff] %vm627_vm1, %v1250_v58  ;;  %1262 = vst.msk [vmem:[%s2204_s14 + $0x20] sm:$0xff] %vm627_vm1, %v1254_v59  ;;  %v1229_v62 = vadd.f32 %v1355_v51, %v1214_v34  ;;  %v1233_v0 = vadd.f32 %v1355_v51, %v1218_v57 }
 0x3c0   : > { %v1228_v1 = vadd.f32 %v1355_v51, %v1213_v60 }
 0x3c1   : > { %v1232_v2 = vadd.f32 %v1355_v51, %v1217_v61  ;;  %vm1237_vm8 = vcmp.ge.f32.partialorder %v1229_v62, 0.0  ;;  %v1245_v3 = vmul.f32 0.1, %v1229_v62  ;;  %vm1241_vm9 = vcmp.ge.f32.partialorder %v1233_v0, 0.0 }
 0x3c2   : > { %v1249_v4 = vmul.f32 0.1, %v1233_v0  ;;  %vm1236_vm10 = vcmp.ge.f32.partialorder %v1228_v1, 0.0  ;;  %v1244_v6 = vmul.f32 0.1, %v1228_v1 }
 0x3c3   : > { %vm1240_vm11 = vcmp.ge.f32.partialorder %v1232_v2, 0.0  ;;  %v1248_v8 = vmul.f32 0.1, %v1232_v2  ;;  %v1253_v9 = vsel %vm1237_vm8, %v1229_v62, %v1245_v3 }
 0x3c4   : > { %v1257_v10 = vsel %vm1241_vm9, %v1233_v0, %v1249_v4  ;;  %1261 = vst.msk [vmem:[%s2204_s14 + $0x18] sm:$0xff] %vm627_vm1, %v1253_v9  ;;  %v1252_v11 = vsel %vm1236_vm10, %v1228_v1, %v1244_v6 }
 0x3c5   : > { %1265 = vst.msk [vmem:[%s2204_s14 + $0x38] sm:$0xff] %vm627_vm1, %v1257_v10  ;;  %v1256_v12 = vsel %vm1240_vm11, %v1232_v2, %v1248_v8  ;;  %1260 = vst.msk [vmem:[%s2204_s14 + $0x10] sm:$0xff] %vm627_vm1, %v1252_v11 }
 0x3c6   : > { %1264 = vst.msk [vmem:[%s2204_s14 + $0x30] sm:$0xff] %vm627_vm1, %v1256_v12 }
 0x3c7 PF: > { %s18_s27 = sadd.s32 1, %s1773_s27  }
 0x3c8   : > { %p15_p4 = scmp.ge.s32.totalorder %s18_s27, 4  }
 0x3ca   :  { %17 = sbr.rel (!%p15_p4) target bundleno = 1 (0x1), region = 82 }

</bundles_post_ra>
